<compile_context>
chip_gen: v7x
topology: tpu7x:2x2x1
jax: 0.10.0
libtpu: 0.0.40
codegen_flags: <defaults>
</compile_context>

<pallas_src>
import jax
import jax.numpy as jnp
from jax.experimental import pallas as pl
from jax.experimental.pallas import tpu as pltpu


# ----------------------------------------------------------------------------
# parameter slab layout (single contiguous VMEM weight slab)
# ----------------------------------------------------------------------------
def _round8(v):
    return ((v + 7) // 8) * 8


def _slab_layout(D):
    """Row-block layout; every block starts at a sublane multiple of 8, lane 0."""
    layout = {}
    r = 0

    def add(name, n_rows, n_cols):
        nonlocal r
        layout[name] = (r, n_rows, 0, n_cols)
        r = _round8(r + n_rows)

    add("w1T", 16, D)      # t-MLP layer 1 weight^T  (16, D)
    add("weT", D, D)       # encoder weight^T        (D, D)
    add("w2T", 8, 16)      # t-MLP layer 2 weight^T  (8, 16)
    add("w3pT", D, 8)      # zero-padded layer 3 weight^T (D, 8), row 0 == 0
    add("b1", 16, 1)
    add("be", D, 1)
    add("b2", 8, 1)
    add("b3p", D, 1)       # zero-padded bias, row 0 == 0
    add("onehot", D, 1)    # constant e0 = (1, 0, ..., 0)^T
    rows = _round8(r)
    cols = max(D, 16)
    return layout, rows, cols


def make_raw_params(key, D):
    """Deterministic synthetic parameters in natural (in, out) form."""
    ks = jax.random.split(key, 8)
    s = 0.1
    return dict(
        we=s * jax.random.normal(ks[0], (D, D), jnp.float32),
        be=s * jax.random.normal(ks[1], (D,), jnp.float32),
        w1=s * jax.random.normal(ks[2], (D, 16), jnp.float32),
        b1=s * jax.random.normal(ks[3], (16,), jnp.float32),
        w2=s * jax.random.normal(ks[4], (16, 8), jnp.float32),
        b2=s * jax.random.normal(ks[5], (8,), jnp.float32),
        w3=s * jax.random.normal(ks[6], (8, D - 1), jnp.float32),
        b3=s * jax.random.normal(ks[7], (D - 1,), jnp.float32),
        c=jnp.ones((1,), jnp.float32),          # self.c = Parameter([1.0])
    )


def pack_params(raw, D):
    """Pack all weights/biases/constants into one f32 slab + one SMEM scalar."""
    layout, rows, cols = _slab_layout(D)
    slab = jnp.zeros((rows, cols), jnp.float32)

    w3p = jnp.concatenate([jnp.zeros((8, 1), jnp.float32), raw["w3"]], axis=1)  # (8, D)
    b3p = jnp.concatenate([jnp.zeros((1,), jnp.float32), raw["b3"]], axis=0)    # (D,)
    onehot = jnp.zeros((D,), jnp.float32).at[0].set(1.0)

    entries = {
        "w1T": raw["w1"].T,
        "weT": raw["we"].T,
        "w2T": raw["w2"].T,
        "w3pT": w3p.T,
        "b1": raw["b1"].reshape(-1, 1),
        "be": raw["be"].reshape(-1, 1),
        "b2": raw["b2"].reshape(-1, 1),
        "b3p": b3p.reshape(-1, 1),
        "onehot": onehot.reshape(-1, 1),
    }
    for name, mat in entries.items():
        r, nr, c0, nc = layout[name]
        assert mat.shape == (nr, nc), (name, mat.shape, (nr, nc))
        slab = slab.at[r:r + nr, c0:c0 + nc].set(mat)

    inv_sqrt_c = (1.0 / jnp.sqrt(raw["c"])).reshape(1).astype(jnp.float32)
    return slab, inv_sqrt_c


# ----------------------------------------------------------------------------
# kernel
# ----------------------------------------------------------------------------
def _elu(h):
    # PyTorch nn.ELU(alpha=1.0); clamp the exp argument so the dead branch is finite.
    return jnp.where(h > 0, h, jnp.exp(jnp.minimum(h, 0.0)) - 1.0)


def _build_kernel(layout):
    def kernel(x_ref, t_ref, slab_ref, isc_ref, out_ref):
        # Lane-dense layout: feature axis D on sublanes, batch tile TN on lanes.
        x = x_ref[...]          # (D, TN) hyperboloid points (columns)
        t_in = t_ref[...]       # (D, TN) time embeddings
        isc = isc_ref[0]        # SMEM scalar: 1 / sqrt(c)

        def blk(name):
            r, nr, c0, nc = layout[name]
            return slab_ref[r:r + nr, c0:c0 + nc]

        # ---- t_layers MLP (three small MXU matmuls over TN lanes) ----
        h = jnp.dot(blk("w1T"), t_in, preferred_element_type=jnp.float32) + blk("b1")
        h = _elu(h)                                                           # (16, TN)
        h = jnp.dot(blk("w2T"), h, preferred_element_type=jnp.float32) + blk("b2")
        h = _elu(h)                                                           # (8, TN)
        # w3pT/b3pT have a zero first row -> directly emits cat([zeros, t], -1)^T.
        t_full = jnp.dot(blk("w3pT"), h, preferred_element_type=jnp.float32) + blk("b3p")

        # ---- expmap0 on the Lorentz manifold (k = 1) ----
        # Tangent vector at origin has zero time coordinate, so its Minkowski
        # norm equals the Euclidean norm of the spatial part.
        sumsq = jnp.sum(t_full * t_full, axis=0, keepdims=True)               # (1, TN)
        sumsq_c = jnp.maximum(sumsq, 1e-8)
        unorm = jnp.sqrt(sumsq_c)
        e_pos = jnp.exp(unorm)
        e_neg = jnp.exp(-unorm)                 # exact, no approx-reciprocal error
        cosh_u = 0.5 * (e_pos + e_neg)
        sinh_u = 0.5 * (e_pos - e_neg)
        scale = sinh_u * jax.lax.rsqrt(sumsq_c)
        # small-norm series guard: sinh(u)/u -> 1 + u^2/6 (avoids cancellation)
        scale = jnp.where(sumsq_c < 1e-6, 1.0 + sumsq_c * (1.0 / 6.0), scale)
        # scale * t_full has an exactly-zero row 0; add cosh only to row 0.
        t_hyp = scale * t_full + blk("onehot") * cosh_u                       # (D, TN)

        # ---- encoder (synthetic Linear stand-in) ----
        x_enc = jnp.dot(blk("weT"), x, preferred_element_type=jnp.float32) + blk("be")

        # ---- average + projection back onto the hyperboloid ----
        ave = t_hyp + x_enc
        ave0 = ave[0:1, :]
        # Minkowski inner product: sum(v*w) - 2*v0*w0  (metric diag(-1,1,...,1))
        inner_aa = jnp.sum(ave * ave, axis=0, keepdims=True) - 2.0 * ave0 * ave0
        inv_denom = jax.lax.rsqrt(jnp.maximum(jnp.abs(inner_aa), 1e-8)) * isc
        y = ave * inv_denom                                                   # point on hyperboloid

        # ---- logmap_{xt}(y) on the Lorentz manifold (k = 1) ----
        xy = jnp.sum(x * y, axis=0, keepdims=True) - 2.0 * x[0:1, :] * y[0:1, :]
        alpha = jnp.maximum(-xy, 1.0 + 1e-7)
        # arccosh(alpha) with factored sqrt (less cancellation near alpha -> 1)
        dist = jnp.log(alpha + jnp.sqrt((alpha - 1.0) * (alpha + 1.0)))
        nomin = y + xy * x
        nn0 = nomin[0:1, :]
        nn2 = jnp.sum(nomin * nomin, axis=0, keepdims=True) - 2.0 * nn0 * nn0
        out = (dist * jax.lax.rsqrt(jnp.maximum(nn2, 1e-8))) * nomin

        out_ref[...] = out.astype(out_ref.dtype)

    return kernel


# ----------------------------------------------------------------------------
# wrapper
# ----------------------------------------------------------------------------
def _pick_tile_n(n, *, max_tile=8192, target_steps=4):
    """Large lane tiles (overhead-bound kernel); ~4 even grid steps when possible."""
    if n % 128 != 0 or n <= 128:
        return n                                   # single full-extent block
    tile = min(max_tile, max(128, (n // target_steps) // 128 * 128))
    while n % tile != 0:
        tile -= 128
    return tile


def score_model_forward(x_dn, t_dn, slab, inv_sqrt_c, *, tile_n=None):
    """Lane-dense forward.

    x_dn, t_dn: (D, N) float32 -- column j is sample j (i.e. the transpose of
    the PyTorch (N, D) inputs).  Returns the tangent vector at x as (D, N).
    Keeping (D, N) end-to-end removes all HBM transpose passes.
    """
    D, N = x_dn.shape
    tile_n = _pick_tile_n(N) if tile_n is None else tile_n
    assert N % tile_n == 0, "batch size must be divisible by tile_n"

    layout, rows, cols = _slab_layout(D)
    assert slab.shape == (rows, cols)

    col_spec = pl.BlockSpec((D, tile_n), lambda i: (0, i))

    return pl.pallas_call(
        _build_kernel(layout),
        out_shape=jax.ShapeDtypeStruct((D, N), jnp.float32),
        grid=(N // tile_n,),
        in_specs=[
            col_spec,                                            # x   (D, N) -> (D, tile_n)
            col_spec,                                            # t   (D, N) -> (D, tile_n)
            pl.BlockSpec(slab.shape, lambda i: (0, 0)),          # packed weight slab
            pl.BlockSpec(memory_space=pltpu.MemorySpace.SMEM),   # 1/sqrt(c) scalar
        ],
        out_specs=col_spec,
        compiler_params=pltpu.CompilerParams(
            dimension_semantics=("parallel",)),
    )(x_dn, t_dn, slab, inv_sqrt_c)


# ----------------------------------------------------------------------------
# pure-JAX reference (mirrors the PyTorch forward in (N, D) row layout)
# ----------------------------------------------------------------------------
def reference_forward(x, t, raw):
    xt = x
    h = _elu(t @ raw["w1"] + raw["b1"])
    h = _elu(h @ raw["w2"] + raw["b2"])
    h = h @ raw["w3"] + raw["b3"]                                    # (N, D-1)
    tt = jnp.concatenate([jnp.zeros_like(h[:, :1]), h], axis=-1)     # (N, D)

    sumsq = jnp.sum(tt * tt, axis=-1, keepdims=True)
    sumsq_c = jnp.maximum(sumsq, 1e-8)
    u = jnp.sqrt(sumsq_c)
    cosh_u, sinh_u = jnp.cosh(u), jnp.sinh(u)
    scale = jnp.where(sumsq_c < 1e-6, 1.0 + sumsq_c / 6.0, sinh_u / u)
    e0 = jnp.zeros((x.shape[-1],), jnp.float32).at[0].set(1.0)
    t_hyp = scale * tt + cosh_u * e0

    x_enc = x @ raw["we"] + raw["be"]
    ave = t_hyp + x_enc

    def minner(a, b):
        return jnp.sum(a * b, -1, keepdims=True) - 2.0 * a[:, :1] * b[:, :1]

    denom = jnp.sqrt(jnp.maximum(jnp.abs(minner(ave, ave)), 1e-8)) * jnp.sqrt(raw["c"])
    y = ave / denom
    xy = minner(xt, y)
    alpha = jnp.maximum(-xy, 1.0 + 1e-7)
    dist = jnp.arccosh(alpha)
    nomin = y + xy * xt
    return dist * nomin / jnp.sqrt(jnp.maximum(minner(nomin, nomin), 1e-8))


# ----------------------------------------------------------------------------
# demo
# ----------------------------------------------------------------------------
if __name__ == "__main__":
    # args.feat_dim = 15  ->  feat_dim becomes 16 inside __init__
    N, D = 4096, 16                       # grid of 4 x 1024-wide batch tiles
    key = jax.random.PRNGKey(0)
    k_x, k_t, k_p = jax.random.split(key, 3)

    # Inputs built directly in lane-dense (D, N) layout (column j = sample j);
    # x is a valid point on the k=1 hyperboloid: x0 = sqrt(1 + ||x_spatial||^2).
    x_sp = 0.5 * jax.random.normal(k_x, (D - 1, N), jnp.float32)
    x0 = jnp.sqrt(1.0 + jnp.sum(x_sp * x_sp, axis=0, keepdims=True))
    x_dn = jnp.concatenate([x0, x_sp], axis=0)                    # (D, N)
    t_dn = jax.random.uniform(k_t, (D, N), jnp.float32)           # time embedding (D, N)

    raw = make_raw_params(k_p, D)
    slab, inv_sqrt_c = pack_params(raw, D)

    out_dn = score_model_forward(x_dn, t_dn, slab, inv_sqrt_c)
    out_dn = jax.block_until_ready(out_dn)

    assert out_dn.shape == (D, N) and out_dn.dtype == jnp.float32
    assert bool(jnp.all(jnp.isfinite(out_dn)))

    # loose sanity check against a pure-JAX (N, D) reference of the same math
    with jax.default_matmul_precision("highest"):
        ref = reference_forward(x_dn.T, t_dn.T, raw)
    err = float(jnp.max(jnp.abs(out_dn.T - ref)))
    assert err < 5e-2, f"mismatch vs reference: {err}"

    print("KERNEL_OK")
</pallas_src>

<mosaic_0001>
module attributes {stable_mosaic.version = 11 : i64} {
  func.func @kernel(%arg0: i32, %arg1: memref<16x1024xf32, #tpu.memory_space<vmem>>, %arg2: memref<16x1024xf32, #tpu.memory_space<vmem>>, %arg3: memref<128x16xf32, #tpu.memory_space<vmem>>, %arg4: memref<1xf32, #tpu.memory_space<smem>>, %arg5: memref<16x1024xf32, #tpu.memory_space<vmem>>) attributes {dimension_semantics = [#tpu.dimension_semantics<parallel>], iteration_bounds = array<i64: 4>, scalar_prefetch = 0 : i64, scratch_operands = 0 : i64, tpu.core_type = #tpu.core_type<tc>, window_params = [{transform_indices = @transform_0, window_bounds = array<i64: 16, 1024>}, {transform_indices = @transform_1, window_bounds = array<i64: 16, 1024>}, {pipeline_mode = #tpu.pipeline_mode<synchronous>, transform_indices = @transform_2, window_bounds = array<i64: 128, 16>}, {transform_indices = @transform_3, window_bounds = array<i64: 1>}, {transform_indices = @transform_4, window_bounds = array<i64: 16, 1024>}]} {
    %c0 = arith.constant 0 : index
    %c0_0 = arith.constant 0 : index
    %0 = vector.load %arg1[%c0, %c0_0] : memref<16x1024xf32, #tpu.memory_space<vmem>>, vector<16x1024xf32>
    %c0_1 = arith.constant 0 : index
    %c0_2 = arith.constant 0 : index
    %1 = vector.load %arg2[%c0_1, %c0_2] : memref<16x1024xf32, #tpu.memory_space<vmem>>, vector<16x1024xf32>
    %c0_3 = arith.constant 0 : index
    %2 = memref.load %arg4[%c0_3] : memref<1xf32, #tpu.memory_space<smem>>
    %c0_4 = arith.constant 0 : index
    %c0_5 = arith.constant 0 : index
    %3 = vector.load %arg3[%c0_4, %c0_5] : memref<128x16xf32, #tpu.memory_space<vmem>>, vector<16x16xf32>
    %cst = arith.constant dense<0.000000e+00> : vector<16x1024xf32>
    %4 = tpu.matmul %3, %1, %cst {dimension_numbers = #tpu.dot_dimension_numbers<[1], [0], [0], [1], [0, 0, 1, 1], [], []>} : vector<16x16xf32>, vector<16x1024xf32>, vector<16x1024xf32> -> vector<16x1024xf32>
    %c56 = arith.constant 56 : index
    %c0_6 = arith.constant 0 : index
    %5 = vector.load %arg3[%c56, %c0_6] : memref<128x16xf32, #tpu.memory_space<vmem>>, vector<16x1xf32>
    %6 = vector.broadcast %5 : vector<16x1xf32> to vector<16x1024xf32>
    %7 = arith.addf %4, %6 : vector<16x1024xf32>
    %cst_7 = arith.constant 0.000000e+00 : f32
    %8 = vector.broadcast %cst_7 : f32 to vector<16x1024xf32>
    %9 = arith.cmpf ogt, %7, %8 : vector<16x1024xf32>
    %cst_8 = arith.constant 0.000000e+00 : f32
    %10 = vector.broadcast %cst_8 : f32 to vector<16x1024xf32>
    %11 = arith.minimumf %7, %10 : vector<16x1024xf32>
    %12 = math.exp %11 : vector<16x1024xf32>
    %cst_9 = arith.constant 1.000000e+00 : f32
    %13 = vector.broadcast %cst_9 : f32 to vector<16x1024xf32>
    %14 = arith.subf %12, %13 : vector<16x1024xf32>
    %15 = arith.select %9, %7, %14 : vector<16x1024xi1>, vector<16x1024xf32>
    %c32 = arith.constant 32 : index
    %c0_10 = arith.constant 0 : index
    %16 = vector.load %arg3[%c32, %c0_10] : memref<128x16xf32, #tpu.memory_space<vmem>>, vector<8x16xf32>
    %cst_11 = arith.constant dense<0.000000e+00> : vector<8x1024xf32>
    %17 = tpu.matmul %16, %15, %cst_11 {dimension_numbers = #tpu.dot_dimension_numbers<[1], [0], [0], [1], [0, 0, 1, 1], [], []>} : vector<8x16xf32>, vector<16x1024xf32>, vector<8x1024xf32> -> vector<8x1024xf32>
    %c88 = arith.constant 88 : index
    %c0_12 = arith.constant 0 : index
    %18 = vector.load %arg3[%c88, %c0_12] : memref<128x16xf32, #tpu.memory_space<vmem>>, vector<8x1xf32>
    %19 = vector.broadcast %18 : vector<8x1xf32> to vector<8x1024xf32>
    %20 = arith.addf %17, %19 : vector<8x1024xf32>
    %cst_13 = arith.constant 0.000000e+00 : f32
    %21 = vector.broadcast %cst_13 : f32 to vector<8x1024xf32>
    %22 = arith.cmpf ogt, %20, %21 : vector<8x1024xf32>
    %cst_14 = arith.constant 0.000000e+00 : f32
    %23 = vector.broadcast %cst_14 : f32 to vector<8x1024xf32>
    %24 = arith.minimumf %20, %23 : vector<8x1024xf32>
    %25 = math.exp %24 : vector<8x1024xf32>
    %cst_15 = arith.constant 1.000000e+00 : f32
    %26 = vector.broadcast %cst_15 : f32 to vector<8x1024xf32>
    %27 = arith.subf %25, %26 : vector<8x1024xf32>
    %28 = arith.select %22, %20, %27 : vector<8x1024xi1>, vector<8x1024xf32>
    %c40 = arith.constant 40 : index
    %c0_16 = arith.constant 0 : index
    %29 = vector.load %arg3[%c40, %c0_16] : memref<128x16xf32, #tpu.memory_space<vmem>>, vector<16x8xf32>
    %cst_17 = arith.constant dense<0.000000e+00> : vector<16x1024xf32>
    %30 = tpu.matmul %29, %28, %cst_17 {dimension_numbers = #tpu.dot_dimension_numbers<[1], [0], [0], [1], [0, 0, 1, 1], [], []>} : vector<16x8xf32>, vector<8x1024xf32>, vector<16x1024xf32> -> vector<16x1024xf32>
    %c96 = arith.constant 96 : index
    %c0_18 = arith.constant 0 : index
    %31 = vector.load %arg3[%c96, %c0_18] : memref<128x16xf32, #tpu.memory_space<vmem>>, vector<16x1xf32>
    %32 = vector.broadcast %31 : vector<16x1xf32> to vector<16x1024xf32>
    %33 = arith.addf %30, %32 : vector<16x1024xf32>
    %34 = arith.mulf %33, %33 : vector<16x1024xf32>
    %cst_19 = arith.constant dense<0.000000e+00> : vector<1024xf32>
    %35 = vector.multi_reduction <add>, %34, %cst_19 [0] : vector<16x1024xf32> to vector<1024xf32>
    %36 = vector.shape_cast %35 : vector<1024xf32> to vector<1x1024xf32>
    %cst_20 = arith.constant 9.99999993E-9 : f32
    %37 = vector.broadcast %cst_20 : f32 to vector<1x1024xf32>
    %38 = arith.maximumf %36, %37 : vector<1x1024xf32>
    %39 = math.sqrt %38 : vector<1x1024xf32>
    %40 = math.exp %39 : vector<1x1024xf32>
    %cst_21 = arith.constant 0.000000e+00 : f32
    %41 = vector.broadcast %cst_21 : f32 to vector<1x1024xf32>
    %42 = arith.subf %41, %39 : vector<1x1024xf32>
    %43 = math.exp %42 : vector<1x1024xf32>
    %44 = arith.addf %40, %43 : vector<1x1024xf32>
    %cst_22 = arith.constant 5.000000e-01 : f32
    %45 = vector.broadcast %cst_22 : f32 to vector<1x1024xf32>
    %46 = arith.mulf %45, %44 : vector<1x1024xf32>
    %47 = arith.subf %40, %43 : vector<1x1024xf32>
    %cst_23 = arith.constant 5.000000e-01 : f32
    %48 = vector.broadcast %cst_23 : f32 to vector<1x1024xf32>
    %49 = arith.mulf %48, %47 : vector<1x1024xf32>
    %50 = math.rsqrt %38 : vector<1x1024xf32>
    %51 = arith.mulf %49, %50 : vector<1x1024xf32>
    %cst_24 = arith.constant 9.99999997E-7 : f32
    %52 = vector.broadcast %cst_24 : f32 to vector<1x1024xf32>
    %53 = arith.cmpf olt, %38, %52 : vector<1x1024xf32>
    %cst_25 = arith.constant 0.166666672 : f32
    %54 = vector.broadcast %cst_25 : f32 to vector<1x1024xf32>
    %55 = arith.mulf %38, %54 : vector<1x1024xf32>
    %cst_26 = arith.constant 1.000000e+00 : f32
    %56 = vector.broadcast %cst_26 : f32 to vector<1x1024xf32>
    %57 = arith.addf %56, %55 : vector<1x1024xf32>
    %58 = arith.select %53, %57, %51 : vector<1x1024xi1>, vector<1x1024xf32>
    %59 = vector.broadcast %58 : vector<1x1024xf32> to vector<16x1024xf32>
    %60 = arith.mulf %59, %33 : vector<16x1024xf32>
    %c112 = arith.constant 112 : index
    %c0_27 = arith.constant 0 : index
    %61 = vector.load %arg3[%c112, %c0_27] : memref<128x16xf32, #tpu.memory_space<vmem>>, vector<16x1xf32>
    %62 = vector.broadcast %61 : vector<16x1xf32> to vector<16x1024xf32>
    %63 = vector.broadcast %46 : vector<1x1024xf32> to vector<16x1024xf32>
    %64 = arith.mulf %62, %63 : vector<16x1024xf32>
    %65 = arith.addf %60, %64 : vector<16x1024xf32>
    %c16 = arith.constant 16 : index
    %c0_28 = arith.constant 0 : index
    %66 = vector.load %arg3[%c16, %c0_28] : memref<128x16xf32, #tpu.memory_space<vmem>>, vector<16x16xf32>
    %cst_29 = arith.constant dense<0.000000e+00> : vector<16x1024xf32>
    %67 = tpu.matmul %66, %0, %cst_29 {dimension_numbers = #tpu.dot_dimension_numbers<[1], [0], [0], [1], [0, 0, 1, 1], [], []>} : vector<16x16xf32>, vector<16x1024xf32>, vector<16x1024xf32> -> vector<16x1024xf32>
    %c72 = arith.constant 72 : index
    %c0_30 = arith.constant 0 : index
    %68 = vector.load %arg3[%c72, %c0_30] : memref<128x16xf32, #tpu.memory_space<vmem>>, vector<16x1xf32>
    %69 = vector.broadcast %68 : vector<16x1xf32> to vector<16x1024xf32>
    %70 = arith.addf %67, %69 : vector<16x1024xf32>
    %71 = arith.addf %65, %70 : vector<16x1024xf32>
    %72 = vector.extract_strided_slice %71 {offsets = [0, 0], sizes = [1, 1024], strides = [1, 1]} : vector<16x1024xf32> to vector<1x1024xf32>
    %73 = arith.mulf %71, %71 : vector<16x1024xf32>
    %cst_31 = arith.constant dense<0.000000e+00> : vector<1024xf32>
    %74 = vector.multi_reduction <add>, %73, %cst_31 [0] : vector<16x1024xf32> to vector<1024xf32>
    %75 = vector.shape_cast %74 : vector<1024xf32> to vector<1x1024xf32>
    %cst_32 = arith.constant 2.000000e+00 : f32
    %76 = vector.broadcast %cst_32 : f32 to vector<1x1024xf32>
    %77 = arith.mulf %76, %72 : vector<1x1024xf32>
    %78 = arith.mulf %77, %72 : vector<1x1024xf32>
    %79 = arith.subf %75, %78 : vector<1x1024xf32>
    %80 = math.absf %79 : vector<1x1024xf32>
    %cst_33 = arith.constant 9.99999993E-9 : f32
    %81 = vector.broadcast %cst_33 : f32 to vector<1x1024xf32>
    %82 = arith.maximumf %80, %81 : vector<1x1024xf32>
    %83 = math.rsqrt %82 : vector<1x1024xf32>
    %84 = vector.broadcast %2 : f32 to vector<1x1024xf32>
    %85 = arith.mulf %83, %84 : vector<1x1024xf32>
    %86 = vector.broadcast %85 : vector<1x1024xf32> to vector<16x1024xf32>
    %87 = arith.mulf %71, %86 : vector<16x1024xf32>
    %88 = arith.mulf %0, %87 : vector<16x1024xf32>
    %cst_34 = arith.constant dense<0.000000e+00> : vector<1024xf32>
    %89 = vector.multi_reduction <add>, %88, %cst_34 [0] : vector<16x1024xf32> to vector<1024xf32>
    %90 = vector.shape_cast %89 : vector<1024xf32> to vector<1x1024xf32>
    %91 = vector.extract_strided_slice %0 {offsets = [0, 0], sizes = [1, 1024], strides = [1, 1]} : vector<16x1024xf32> to vector<1x1024xf32>
    %cst_35 = arith.constant 2.000000e+00 : f32
    %92 = vector.broadcast %cst_35 : f32 to vector<1x1024xf32>
    %93 = arith.mulf %92, %91 : vector<1x1024xf32>
    %94 = vector.extract_strided_slice %87 {offsets = [0, 0], sizes = [1, 1024], strides = [1, 1]} : vector<16x1024xf32> to vector<1x1024xf32>
    %95 = arith.mulf %93, %94 : vector<1x1024xf32>
    %96 = arith.subf %90, %95 : vector<1x1024xf32>
    %cst_36 = arith.constant 0.000000e+00 : f32
    %97 = vector.broadcast %cst_36 : f32 to vector<1x1024xf32>
    %98 = arith.subf %97, %96 : vector<1x1024xf32>
    %cst_37 = arith.constant 1.00000012 : f32
    %99 = vector.broadcast %cst_37 : f32 to vector<1x1024xf32>
    %100 = arith.maximumf %98, %99 : vector<1x1024xf32>
    %cst_38 = arith.constant 1.000000e+00 : f32
    %101 = vector.broadcast %cst_38 : f32 to vector<1x1024xf32>
    %102 = arith.subf %100, %101 : vector<1x1024xf32>
    %cst_39 = arith.constant 1.000000e+00 : f32
    %103 = vector.broadcast %cst_39 : f32 to vector<1x1024xf32>
    %104 = arith.addf %100, %103 : vector<1x1024xf32>
    %105 = arith.mulf %102, %104 : vector<1x1024xf32>
    %106 = math.sqrt %105 : vector<1x1024xf32>
    %107 = arith.addf %100, %106 : vector<1x1024xf32>
    %108 = math.log %107 : vector<1x1024xf32>
    %109 = vector.broadcast %96 : vector<1x1024xf32> to vector<16x1024xf32>
    %110 = arith.mulf %109, %0 : vector<16x1024xf32>
    %111 = arith.addf %87, %110 : vector<16x1024xf32>
    %112 = vector.extract_strided_slice %111 {offsets = [0, 0], sizes = [1, 1024], strides = [1, 1]} : vector<16x1024xf32> to vector<1x1024xf32>
    %113 = arith.mulf %111, %111 : vector<16x1024xf32>
    %cst_40 = arith.constant dense<0.000000e+00> : vector<1024xf32>
    %114 = vector.multi_reduction <add>, %113, %cst_40 [0] : vector<16x1024xf32> to vector<1024xf32>
    %115 = vector.shape_cast %114 : vector<1024xf32> to vector<1x1024xf32>
    %cst_41 = arith.constant 2.000000e+00 : f32
    %116 = vector.broadcast %cst_41 : f32 to vector<1x1024xf32>
    %117 = arith.mulf %116, %112 : vector<1x1024xf32>
    %118 = arith.mulf %117, %112 : vector<1x1024xf32>
    %119 = arith.subf %115, %118 : vector<1x1024xf32>
    %cst_42 = arith.constant 9.99999993E-9 : f32
    %120 = vector.broadcast %cst_42 : f32 to vector<1x1024xf32>
    %121 = arith.maximumf %119, %120 : vector<1x1024xf32>
    %122 = math.rsqrt %121 : vector<1x1024xf32>
    %123 = arith.mulf %108, %122 : vector<1x1024xf32>
    %124 = vector.broadcast %123 : vector<1x1024xf32> to vector<16x1024xf32>
    %125 = arith.mulf %124, %111 : vector<16x1024xf32>
    %c0_43 = arith.constant 0 : index
    %c0_44 = arith.constant 0 : index
    %126 = vector.load %arg5[%c0_43, %c0_44] : memref<16x1024xf32, #tpu.memory_space<vmem>>, vector<16x1024xf32>
    tpu.vector_store %arg5[%c0_43, %c0_44], %125 {strides = array<i32>} : memref<16x1024xf32, #tpu.memory_space<vmem>>, vector<16x1024xf32>,
    return
  }
  func.func @transform_0(%arg0: i32) -> (i32, i32) {
    %c0_i32 = arith.constant 0 : i32
    %c0_i32_0 = arith.constant 0 : i32
    return %c0_i32, %arg0 : i32, i32
  }
  func.func @transform_1(%arg0: i32) -> (i32, i32) {
    %c0_i32 = arith.constant 0 : i32
    %c0_i32_0 = arith.constant 0 : i32
    return %c0_i32, %arg0 : i32, i32
  }
  func.func @transform_2(%arg0: i32) -> (i32, i32) {
    %c0_i32 = arith.constant 0 : i32
    %c0_i32_0 = arith.constant 0 : i32
    %c0_i32_1 = arith.constant 0 : i32
    return %c0_i32, %c0_i32_0 : i32, i32
  }
  func.func @transform_3(%arg0: i32) -> i32 {
    %c0_i32 = arith.constant 0 : i32
    %c0_i32_0 = arith.constant 0 : i32
    return %c0_i32 : i32
  }
  func.func @transform_4(%arg0: i32) -> (i32, i32) {
    %c0_i32 = arith.constant 0 : i32
    %c0_i32_0 = arith.constant 0 : i32
    return %c0_i32, %arg0 : i32, i32
  }
}

</mosaic_0001>

<bundles_post_ra>
// kernel: tpu_custom_call.1
= control target key start
LH: loop header
LB: loop body
LE: loop exit
PB: predicated region body
PF: predicated region fallthrough
CT: control target
= control target key end

     0   :  { %s4758_s0 = inlined_call_operand.hbm [shape: f32[16,4096], index: 0, kind: input, shape index: {}]   ;;  %s4759_s1 = inlined_call_operand.hbm [shape: f32[16,4096], index: 1, kind: input, shape index: {}]   ;;  %s4760_s2 = inlined_call_operand.vmem [shape: f32[128,16], index: 2, kind: input, shape index: {}]   ;;  %s4761_s3 = inlined_call_operand.<no memory space> [shape: f32[1], index: 3, kind: input, shape index: {}]   ;;  %s4762_s4 = inlined_call_operand.hbm [shape: f32[16,4096], index: 4, kind: output, shape index: {}]  }
   0x1   :  { %9 = sst [smem:[#allocation2]] %s4761_s3 }
   0x2   :  { %10 = vsyncpa [#allocation4], 0 }
   0x3   :  { %12 = vsyncpa [#allocation4 + $0x1], 0 }
   0x4   :  { %13 = vsyncpa [#allocation7], 0 }
   0x5   :  { %15 = vsyncpa [#allocation7 + $0x1], 0 }
   0x6   :  { %16 = vsyncpa [#allocation5], 0 }
   0x7   :  { %18 = vsyncpa [#allocation5 + $0x1], 0  ;;  %s3337_s17 = smov 0   ;;  %s3339_s18 = smov 0  }
   0x8   :  { %s3341_s19 = smov 0   ;;  %s3343_s20 = smov 0  }
   0x9 LB: > { %s3358_s3 = sadd.s32 4294967295, %s3296_s20   ;;  %s2800_s21 = sadd.s32 4294967294, %s3296_s20   ;;  %s3296_s20 = sphi %s3343_s20, %s4815_s20   ;;  %s3292_s19 = sphi %s3341_s19, %s4814_s19   ;;  %s3288_s18 = sphi %s3339_s18, %s4813_s18   ;;  %s3284_s17 = sphi %s3337_s17, %s4812_s17  }
   0xa   : > { %s3362_s22 = sadd.s32 1, %s3296_s20   ;;  %s31_s23 = sadd.s32 1, %s3292_s19 }
   0xb   : > { %s28_s24 = ssub.s32 %s3296_s20, %s3362_s22  ;;  %p38_p0 = scmp.ne.s32.totalorder %s3292_s19, %s3288_s18 }
   0xc   : > { %p29_p1 = scmp.eq.s32.totalorder %s28_s24, 0  ;;  %p39_p2 = scmp.eq.s32.totalorder %s3296_s20, 0 }
   0xd   : > { %p44_p3 = scmp.ne.s32.totalorder %s3288_s18, %s3284_s17  ;;  %p45_p4 = scmp.eq.s32.totalorder %s3358_s3, 0 }
   0xe   : > { %s3374_s25 = scalar_select %p29_p1, %s3292_s19, %s31_s23  }
   0xf   : > { %p3376_p5 = por %p39_p2, %p38_p0  ;;  %p3380_p6 = por %p45_p4, %p44_p3 }
  0x10   : > { %p136_p7 = scmp.eq.s32.totalorder %s3358_s3, 3  ;;  %p142_p8 = scmp.eq.s32.totalorder %s2800_s21, 3 }
  0x11   : > { %s4772_s27 = scalar_select %p3380_p6, 1, 0 }
  0x12   : > { %p2946_p9 = scmp.lt.s32.totalorder %s3296_s20, 4  ;;  %p3386_p10 = por %p136_p7, %p38_p0 }
  0x13   : > { %p3390_p11 = por %p142_p8, %p44_p3  ;;  %s3395_s30 = sand.u32 1, %s3292_s19  }
  0x14   : > { %s4773_s28 = scalar_select %p3386_p10, 1, 0 }
  0x15   : > { %s4774_s29 = scalar_select %p3390_p11, 1, 0 }
  0x16   : > { %s2878_s5 = sshll.u32 %s3296_s20, 10  ;;  %s2803_s6 = sshll.u32 %s3395_s30, 7 }
  0x17   : > { %s3404_s9 = scalar_lea.hbm %s4758_s0, %s2878_s5  ;;  %s172_s10 = scalar_lea.vmem [#allocation3], %s2803_s6 }
  0x18   : > { %s179_s11 = sshll.u32 %s172_s10, 4  ;;  %p3410_p12 = pnand %p2946_p9, %p3376_p5  ;;  %s3414_s11 = int_to_ptr.vmem [resolvable:$true] %s179_s11 }
  0x19   : > { %s169_s13 = scalar_lea.sflag [#allocation4], %s3395_s30  ;;  %s3166_s14 = scalar_lea.hbm %s3404_s9, 2048 }
  0x1a   : > { %p3167_p0 = scmp.ne.s32.totalorder %s3404_s9, %s3166_s14  ;;  %p3168_p1 = pneg %p3410_p12 }
  0x1b   : > { %s3171_s21 = scalar_lea.hbm %s4758_s0, 8192  ;;  %p3172_p4 = scmp.lt.u32.totalorder %s3404_s9, %s4758_s0 }
  0x1c   : > { %p3169_p2 = pnand %p3168_p1, %p3167_p0  ;;  %p3173_p5 = scmp.lt.u32.totalorder %s3171_s21, %s3166_s14 }
  0x1d   : > { %p3175_p8 = scmp.lt.u32.totalorder %s3166_s14, %s3404_s9 }
  0x1e   : > { %p3170_p3 = pneg %p3169_p2  ;;  %p3174_p7 = por %p3173_p5, %p3172_p4 }
  0x20   : > { %p3176_p9 = por %p3175_p8, %p3174_p7 }
  0x22   : > { %p3177_p13 = pnand %p3176_p9, %p3170_p3 }
  0x24   : > { %3180 = shalt.err (!%p3177_p13)
}
  0x25   : > { %s3181_s26 = scalar_lea.vmem %s3414_s11, 2048  ;;  %s3298_s7 = smov [#allocation3]  }
  0x26   : > { %p3182_p0 = scmp.ne.s32.totalorder %s3414_s11, %s3181_s26  ;;  %s3186_s8 = sshll.u32 %s3298_s7, 4  ;;  %s3187_s8 = int_to_ptr.vmem [resolvable:$false] %s3186_s8 }
  0x27   : > { %s3188_s10 = scalar_lea.vmem %s3187_s8, 4096  ;;  %p3189_p10 = scmp.lt.s32.totalorder %s3414_s11, %s3187_s8 }
  0x28   : > { %p3184_p2 = pnand %p3182_p0, %p3168_p1  ;;  %p3190_p4 = scmp.lt.s32.totalorder %s3188_s10, %s3181_s26 }
  0x2a   : > { %p3185_p11 = pneg %p3184_p2  ;;  %p3191_p5 = por %p3190_p4, %p3189_p10 }
  0x2c   : > { %p3192_p7 = pnand %p3191_p5, %p3185_p11 }
  0x2e   : > { %3195 = shalt.err (!%p3192_p7)
}
  0x2f   : > { %s3299_s14 = smov 4096   ;;  %s3300_s15 = smov 1024  }
  0x30   : > { %s3301_s16 = smov 64   ;;  %p208_p10 = scmp.lt.s32.totalorder %s3296_s20, 5 }
  0x31   : > { %2938 = dma.hbm_to_vmem [thread:$0]  (!%p3410_p12), %s3404_s9, 2048, %s3414_s11, %s169_s13, %s3299_s14, %s3300_s15, %s3301_s16  }
  0x32   : > { %s3454_s24 = scalar_lea.hbm %s4759_s1, %s2878_s5  ;;  %p4776_p11 = scmp.ge.s32.totalorder %s3296_s20, 1 }
  0x33   : > { %s193_s7 = scalar_lea.vmem [#allocation6], %s2803_s6  ;;  %s190_s9 = scalar_lea.sflag [#allocation7], %s3395_s30 }
  0x34   : > { %p3458_p13 = pnand %p4776_p11, %p208_p10  ;;  %s200_s8 = sshll.u32 %s193_s7, 4  ;;  %s3464_s8 = int_to_ptr.vmem [resolvable:$true] %s200_s8 }
  0x35   : > { %s3196_s11 = scalar_lea.hbm %s3454_s24, 2048  ;;  %s3201_s10 = scalar_lea.hbm %s4759_s1, 8192 }
  0x36   : > { %p3197_p3 = scmp.ne.s32.totalorder %s3454_s24, %s3196_s11  ;;  %p3202_p0 = scmp.lt.u32.totalorder %s3454_s24, %s4759_s1 }
  0x37   : > { %p3203_p2 = scmp.lt.u32.totalorder %s3201_s10, %s3196_s11  ;;  %p3205_p5 = scmp.lt.u32.totalorder %s3196_s11, %s3454_s24 }
  0x38   : > { %p3199_p8 = pnand %p3197_p3, %p3168_p1 }
  0x39   : > { %p3204_p4 = por %p3203_p2, %p3202_p0 }
  0x3a   : > { %p3200_p9 = pneg %p3199_p8 }
  0x3b   : > { %p3206_p7 = por %p3205_p5, %p3204_p4 }
  0x3d   : > { %p3207_p10 = pnand %p3206_p7, %p3200_p9 }
  0x3f   : > { %3210 = shalt.err (!%p3207_p10)
}
  0x40   : > { %s3211_s6 = scalar_lea.vmem %s3464_s8, 2048  ;;  %s3302_s7 = smov [#allocation6]  }
  0x41   : > { %p3212_p11 = scmp.ne.s32.totalorder %s3464_s8, %s3211_s6  ;;  %s3216_s5 = sshll.u32 %s3302_s7, 4  ;;  %s3217_s5 = int_to_ptr.vmem [resolvable:$false] %s3216_s5 }
  0x42   : > { %s3218_s13 = scalar_lea.vmem %s3217_s5, 4096  ;;  %p3219_p6 = scmp.lt.s32.totalorder %s3464_s8, %s3217_s5 }
  0x43   : > { %p3214_p3 = pnand %p3212_p11, %p3168_p1  ;;  %p3220_p0 = scmp.lt.s32.totalorder %s3218_s13, %s3211_s6 }
  0x45   : > { %p3215_p8 = pneg %p3214_p3  ;;  %p3221_p2 = por %p3220_p0, %p3219_p6 }
  0x47   : > { %p3222_p4 = pnand %p3221_p2, %p3215_p8 }
  0x49   : > { %3225 = shalt.err (!%p3222_p4)
}
  0x4a   : > { %2941 = dma.hbm_to_vmem [thread:$0]  (!%p3410_p12), %s3454_s24, 2048, %s3464_s8, %s190_s9, %s3299_s14, %s3300_s15, %s3301_s16  }
  0x4b   : > { %212 = sbr.rel (%p3458_p13) target bundleno = 1073 (0x431), region = 36 }
  0x52   : > { %s3498_s11 = sand.u32 1, %s3288_s18   ;;  %p4778_p6 = scmp.ne.s32.totalorder %s4772_s27, 0 }
  0x53   : > { %s3501_s10 = sshll.u32 %s3498_s11, 7  ;;  %s215_s12 = scalar_lea.sflag [#allocation4], %s3498_s11 }
  0x54   : > { %s3505_s21 = scalar_lea.vmem [#allocation3], %s3501_s10 }
  0x55   : > { %3271 = dma.done.wait (%p4778_p6), %s215_s12, 2048  }
  0x56   : > { %3273 = vsyncadd (%p4778_p6), %s215_s12, 4294965248  ;;  %s224_s30 = scalar_lea.sflag [#allocation7], %s3498_s11  ;;  %s3513_s14 = scalar_lea.vmem [#allocation6], %s3501_s10 }
  0x57   : > { %3275 = dma.done.wait (%p4778_p6), %s224_s30, 2048  }
  0x58   : > { %3277 = vsyncadd (%p4778_p6), %s224_s30, 4294965248  ;;  %v3303_v0 = vmov 0.0   ;;  %v3304_v1 = vmov 0   ;;  %v277_v2 = vld [vmem:[%s3513_s14 + $0x8] sm:$0xff]  ;;  %v279_v4 = vld [vmem:[%s3513_s14 + $0x18] sm:$0xff]  ;;  %vm307_vm0 = vcmask 130048  }
  0x59   : > { %378 = vmatprep.mubr.f32.mxu0 %v3303_v0  ;;  %455 = vmatprep.mubr.f32.mxu1 %v3303_v0  ;;  %v285_v3 = vld [vmem:[%s3513_s14 + $0x48] sm:$0xff]  ;;  %v287_v6 = vld [vmem:[%s3513_s14 + $0x58] sm:$0xff]  ;;  %v276_v7 = vld [vmem:[%s3513_s14] sm:$0xff]  ;;  %s4229_s16 = sld [smem:[#allocation2]]  ;;  %s4573_s24 = scalar_lea.vmem [#allocation8], %s3501_s10 }
  0x5a   : > { %2988 = vset.pattern.permute.xlu0 %v3304_v1  ;;  %2989 = vset.pattern.permute.xlu1 %v3304_v1  ;;  %v2881_v5 = vpack.c.bf16 %v285_v3, %v277_v2  ;;  %v284_v8 = vld [vmem:[%s3513_s14 + $0x40] sm:$0xff]  ;;  %v2885_v9 = vpack.c.bf16 %v287_v6, %v279_v4  ;;  %v278_v11 = vld [vmem:[%s3513_s14 + $0x10] sm:$0xff]  ;;  %v281_v15 = vld [vmem:[%s3513_s14 + $0x28] sm:$0xff]  ;;  %s2880_s10 = sshll.u32 %s3358_s3, 10  ;;  %s2691_s23 = scalar_lea.sflag [#allocation5], %s3498_s11 }
  0x5b   : > { %v2883_v10 = vpack.c.bf16 %v284_v8, %v276_v7  ;;  %v286_v12 = vld [vmem:[%s3513_s14 + $0x50] sm:$0xff]  ;;  %v293_v14 = vld [vmem:[%s4760_s2] sm:$0xff]  ;;  %v289_v16 = vld [vmem:[%s3513_s14 + $0x68] sm:$0xff]  ;;  %s4711_s9 = scalar_lea.hbm %s4762_s4, %s2880_s10  ;;  %p4810_p1 = scmp.ne.s32.totalorder %s4773_s28, 0 }
  0x5c   : > { %2882 = vmatprep.subr.bf16.mxu0 %v2881_v5  ;;  %v2887_v13 = vpack.c.bf16 %v286_v12, %v278_v11  ;;  %2886 = vmatprep.subr.bf16.mxu1 %v2885_v9  ;;  %v2889_v17 = vpack.c.bf16 %v289_v16, %v281_v15  ;;  %v283_v18 = vld [vmem:[%s3513_s14 + $0x38] sm:$0xff]  ;;  %v280_v20 = vld [vmem:[%s3513_s14 + $0x20] sm:$0xff]  ;;  %v282_v23 = vld [vmem:[%s3513_s14 + $0x30] sm:$0xff]  ;;  %s3305_s6 = smov [#allocation8]  }
  0x5d   : > { %2884 = vmatpush1.bf16.msra.mxu0 %v2883_v10  ;;  %v291_v19 = vld [vmem:[%s3513_s14 + $0x78] sm:$0xff]  ;;  %v288_v22 = vld [vmem:[%s3513_s14 + $0x60] sm:$0xff]  ;;  %v290_v24 = vld [vmem:[%s3513_s14 + $0x70] sm:$0xff]  ;;  %s3230_s7 = sshll.u32 %s3305_s6, 4  ;;  %s3231_s7 = int_to_ptr.vmem [resolvable:$false] %s3230_s7 }
  0x5e   : > { %2888 = vmatpush1.bf16.msra.mxu1 %v2887_v13  ;;  %v2893_v21 = vpack.c.bf16 %v291_v19, %v283_v18  ;;  %2890 = vmatprep.subr.bf16.mxu0 %v2889_v17  ;;  %v2891_v25 = vpack.c.bf16 %v288_v22, %v280_v20  ;;  %v2895_v26 = vpack.c.bf16 %v290_v24, %v282_v23  ;;  %v295_v27 = vld [vmem:[%s4760_s2 + $0x38] sm:$0xff]  ;;  %v294_v28 = vld [vmem:[%s4760_s2 + $0x8] sm:$0xff]  ;;  %v296_v29 = vld [vmem:[%s4760_s2 + $0x40] sm:$0xff]  ;;  %s3232_s5 = scalar_lea.vmem %s3231_s7, 4096 }
  0x5f   : > { %299 = vperm.xlu0 %2988, %v295_v27   ;;  %v1063_v30 = vld [vmem:[%s4760_s2 + $0x68] sm:$0xff]  ;;  %v1662_v31 = vld [vmem:[%s4760_s2 + $0x78] sm:$0xff]  ;;  %v1708_v32 = vld [vmem:[%s4760_s2 + $0x50] sm:$0xff] }
  0x60   : > { %2813 = vmatmul.mubr.msk.f32.vlgmr.msra.gmra.mrb[0].mxu0 %vm307_vm0, %v293_v14  ;;  %2894 = vmatprep.subr.bf16.mxu1 %v2893_v21  ;;  %v719_v33 = vld [vmem:[%s4760_s2 + $0x58] sm:$0xff]  ;;  %v1062_v34 = vld [vmem:[%s4760_s2 + $0x60] sm:$0xff]  ;;  %v1661_v35 = vld [vmem:[%s4760_s2 + $0x70] sm:$0xff] }
  0x61   : > { %2815 = vmatmul.mubr.msk.f32.vlgmr.msra.gmra.mrb[0].mxu1 %vm307_vm0, %v293_v14  ;;  %384 = vmatprep.mubr.f32.mxu0 %v3303_v0  ;;  %v1707_v36 = vld [vmem:[%s4760_s2 + $0x48] sm:$0xff] }
  0x62   : > { %461 = vmatprep.mubr.f32.mxu1 %v3303_v0  ;;  %2892 = vmatpush1.bf16.msra.mxu0 %v2891_v25 }
  0x63   : > { %2896 = vmatpush1.bf16.msra.mxu1 %v2895_v26  ;;  %304 = vperm.xlu0 %2988, %v296_v29  }
  0x64   : > { %2814 = vmatmul.mubr.msk.f32.gmra.mrb[2].mxu0 %vm307_vm0, %v294_v28  ;;  %722 = vperm.xlu1 %2989, %v719_v33  }
  0x65   : > { %2816 = vmatmul.mubr.msk.f32.gmra.mrb[2].mxu1 %vm307_vm0, %v294_v28  ;;  %532 = vmatprep.mubr.f32.mxu0 %v3303_v0 }
  0x66   : > { %609 = vmatprep.mubr.f32.mxu1 %v3303_v0 }
  0x67   : > { %1071 = vperm.xlu0 %2988, %v1063_v30  }
  0x68   : > { %2817 = vmatmul.mubr.msk.f32.vlgmr.msra.gmra.mrb[4].mxu0 %vm307_vm0, %v293_v14  ;;  %1066 = vperm.xlu1 %2989, %v1062_v34  }
  0x69   : > { %2819 = vmatmul.mubr.msk.f32.vlgmr.msra.gmra.mrb[4].mxu1 %vm307_vm0, %v293_v14  ;;  %538 = vmatprep.mubr.f32.mxu0 %v3303_v0 }
  0x6a   : > { %615 = vmatprep.mubr.f32.mxu1 %v3303_v0 }
  0x6b   : > { %1670 = vperm.xlu0 %2988, %v1662_v31  }
  0x6c   : > { %2818 = vmatmul.mubr.msk.f32.gmra.mrb[6].mxu0 %vm307_vm0, %v294_v28  ;;  %1665 = vperm.xlu1 %2989, %v1661_v35  }
  0x6d   : > { %2820 = vmatmul.mubr.msk.f32.gmra.mrb[6].mxu1 %vm307_vm0, %v294_v28  ;;  %792 = vmatprep.mubr.f32.mxu0 %v3303_v0 }
  0x6e   : > { %863 = vmatprep.mubr.f32.mxu1 %v3303_v0 }
  0x6f   : > { %1716 = vperm.xlu0 %2988, %v1708_v32  }
  0x70   : > { %1711 = vperm.xlu1 %2989, %v1707_v36  }
  0xde   : > { %v300_v37 = vpop.permute.xlu0 %299 }
  0xe2   : > { %v3595_v47 = vpop.permute.xlu0 %304 }
 0x133   : > { %v380_v38 = vpop.f32.mrb[0].mxu0 }
 0x134   : > { %v3586_v39 = vadd.f32 %v380_v38, %v300_v37  ;;  %v457_v40 = vpop.f32.mrb[0].mxu1  ;;  %v382_v41 = vpop.f32.mrb[1].mxu0 }
 0x135   : > { %v3588_v42 = vadd.f32 %v457_v40, %v300_v37  ;;  %v3590_v43 = vadd.f32 %v382_v41, %v300_v37  ;;  %v459_v44 = vpop.f32.mrb[1].mxu1 }
 0x136   : > { %v638_v45 = vmin.f32 %v3586_v39, 0.0  ;;  %v3593_v46 = vadd.f32 %v459_v44, %v300_v37  ;;  %vm622_vm1 = vcmp.gt.f32.partialorder %v3586_v39, 0.0 }
 0x137   : > { %v640_v48 = vmin.f32 %v3588_v42, 0.0  ;;  %v639_v49 = vmin.f32 %v3590_v43, 0.0  ;;  %v386_v50 = vpop.f32.mrb[2].mxu0  ;;  %vm624_vm2 = vcmp.gt.f32.partialorder %v3588_v42, 0.0  ;;  %vm623_vm3 = vcmp.gt.f32.partialorder %v3590_v43, 0.0 }
 0x138   : > { %v654_v51 = vmul.f32 1.442695, %v638_v45  ;;  %v641_v52 = vmin.f32 %v3593_v46, 0.0  ;;  %v3601_v53 = vadd.f32 %v386_v50, %v3595_v47  ;;  %v463_v54 = vpop.f32.mrb[2].mxu1  ;;  %v388_v55 = vpop.f32.mrb[3].mxu0  ;;  %vm625_vm7 = vcmp.gt.f32.partialorder %v3593_v46, 0.0 }
 0x139   : > { %v658_v56 = vmul.f32 1.442695, %v640_v48  ;;  %v656_v57 = vmul.f32 1.442695, %v639_v49  ;;  %v3604_v58 = vadd.f32 %v463_v54, %v3595_v47  ;;  %v3607_v59 = vadd.f32 %v388_v55, %v3595_v47  ;;  %v465_v60 = vpop.f32.mrb[3].mxu1 }
 0x13a   : > { %2990 = vpow2.f32 %v654_v51  ;;  %v660_v61 = vmul.f32 1.442695, %v641_v52  ;;  %v646_v62 = vmin.f32 %v3601_v53, 0.0  ;;  %v3613_v4 = vadd.f32 %v465_v60, %v3595_v47 }
 0x13b   : > { %2992 = vpow2.f32 %v658_v56  ;;  %v648_v63 = vmin.f32 %v3604_v58, 0.0  ;;  %v534_v1 = vpop.f32.mrb[4].mxu0  ;;  %v647_v3 = vmin.f32 %v3607_v59, 0.0  ;;  %vm630_vm4 = vcmp.gt.f32.partialorder %v3601_v53, 0.0 }
 0x13c   : > { %2994 = vpow2.f32 %v656_v57  ;;  %v670_v2 = vmul.f32 1.442695, %v646_v62  ;;  %v611_v5 = vpop.f32.mrb[4].mxu1  ;;  %v536_v6 = vpop.f32.mrb[5].mxu0  ;;  %v3615_v8 = vadd.f32 %v534_v1, %v300_v37  ;;  %v649_v12 = vmin.f32 %v3613_v4, 0.0 }
 0x13d   : > { %2996 = vpow2.f32 %v660_v61  ;;  %v674_v7 = vmul.f32 1.442695, %v648_v63  ;;  %v3617_v9 = vadd.f32 %v611_v5, %v300_v37  ;;  %v613_v10 = vpop.f32.mrb[5].mxu1  ;;  %v672_v11 = vmul.f32 1.442695, %v647_v3 }
 0x13e   : > { %2998 = vpow2.f32 %v670_v2  ;;  %v642_v13 = vmin.f32 %v3615_v8, 0.0  ;;  %v676_v15 = vmul.f32 1.442695, %v649_v12  ;;  %v3622_v17 = vadd.f32 %v536_v6, %v300_v37 }
 0x13f   : > { %3000 = vpow2.f32 %v674_v7  ;;  %v540_v14 = vpop.f32.mrb[6].mxu0  ;;  %v644_v16 = vmin.f32 %v3617_v9, 0.0  ;;  %v3624_v21 = vadd.f32 %v613_v10, %v300_v37  ;;  %vm632_vm5 = vcmp.gt.f32.partialorder %v3604_v58, 0.0 }
 0x140   : > { %3002 = vpow2.f32 %v672_v11  ;;  %v617_v18 = vpop.f32.mrb[6].mxu1  ;;  %v542_v19 = vpop.f32.mrb[7].mxu0  ;;  %v662_v20 = vmul.f32 1.442695, %v642_v13  ;;  %v3627_v22 = vadd.f32 %v540_v14, %v3595_v47  ;;  %v643_v26 = vmin.f32 %v3622_v17, 0.0 }
 0x141   : > { %v3630_v23 = vadd.f32 %v617_v18, %v3595_v47  ;;  %v619_v24 = vpop.f32.mrb[7].mxu1  ;;  %3004 = vpow2.f32 %v676_v15  ;;  %v666_v25 = vmul.f32 1.442695, %v644_v16  ;;  %v645_v27 = vmin.f32 %v3624_v21, 0.0 }
 0x142   : > { %3006 = vpow2.f32 %v662_v20  ;;  %v664_v29 = vmul.f32 1.442695, %v643_v26  ;;  %v650_v30 = vmin.f32 %v3627_v22, 0.0  ;;  %v3639_v34 = vadd.f32 %v542_v19, %v3595_v47 }
 0x143   : > { %3008 = vpow2.f32 %v666_v25  ;;  %v652_v33 = vmin.f32 %v3630_v23, 0.0  ;;  %v668_v37 = vmul.f32 1.442695, %v645_v27  ;;  %v3642_v40 = vadd.f32 %v619_v24, %v3595_v47 }
 0x144   : > { %v2991_v28 = vpop.eup %2990  ;;  %v678_v38 = vmul.f32 1.442695, %v650_v30  ;;  %3010 = vpow2.f32 %v664_v29  ;;  %vm631_vm6 = vcmp.gt.f32.partialorder %v3607_v59, 0.0  ;;  %v651_v51 = vmin.f32 %v3639_v34, 0.0 }
 0x145   : > { %v2993_v31 = vpop.eup %2992  ;;  %v2821_v32 = vadd.f32 -1.0, %v2991_v28  ;;  %v682_v44 = vmul.f32 1.442695, %v652_v33  ;;  %v653_v56 = vmin.f32 %v3642_v40, 0.0  ;;  %vm633_vm8 = vcmp.gt.f32.partialorder %v3613_v4, 0.0 }
 0x146   : > { %v2995_v35 = vpop.eup %2994  ;;  %v2823_v36 = vadd.f32 -1.0, %v2993_v31  ;;  %3012 = vpow2.f32 %v678_v38  ;;  %vm626_vm9 = vcmp.gt.f32.partialorder %v3615_v8, 0.0  ;;  %vm634_vm10 = vcmp.gt.f32.partialorder %v3627_v22, 0.0 }
 0x147   : > { %v2997_v41 = vpop.eup %2996  ;;  %v2822_v48 = vadd.f32 -1.0, %v2995_v35  ;;  %v702_v47 = vsel %vm622_vm1, %v3586_v39, %v2821_v32  ;;  %3014 = vpow2.f32 %v682_v44  ;;  %v680_v39 = vmul.f32 1.442695, %v651_v51 }
 0x148   : > { %v2999_v45 = vpop.eup %2998  ;;  %v704_v54 = vsel %vm624_vm2, %v3588_v42, %v2823_v36  ;;  %3016 = vpow2.f32 %v668_v37  ;;  %v2824_v57 = vadd.f32 -1.0, %v2997_v41  ;;  %v684_v2 = vmul.f32 1.442695, %v653_v56 }
 0x149   : > { %v3001_v49 = vpop.eup %3000  ;;  %v2829_v50 = vadd.f32 -1.0, %v2999_v45  ;;  %v703_v42 = vsel %vm623_vm3, %v3590_v43, %v2822_v48  ;;  %3018 = vpow2.f32 %v680_v39  ;;  %vm628_vm11 = vcmp.gt.f32.partialorder %v3617_v9, 0.0 }
 0x14a   : > { %v3003_v52 = vpop.eup %3002  ;;  %v2831_v55 = vadd.f32 -1.0, %v3001_v49  ;;  %3020 = vpow2.f32 %v684_v2  ;;  %v705_v10 = vsel %vm625_vm7, %v3593_v46, %v2824_v57  ;;  %vm636_vm12 = vcmp.gt.f32.partialorder %v3630_v23, 0.0 }
 0x14b   : > { %v710_v60 = vsel %vm630_vm4, %v3601_v53, %v2829_v50  ;;  %v2830_v61 = vadd.f32 -1.0, %v3003_v52  ;;  %v3005_v62 = vpop.eup %3004  ;;  %vm627_vm13 = vcmp.gt.f32.partialorder %v3622_v17, 0.0  ;;  %vm635_vm14 = vcmp.gt.f32.partialorder %v3639_v34, 0.0 }
 0x14c   : > { %v2899_v63 = vpack.c.bf16 %v710_v60, %v702_v47  ;;  %v712_v1 = vsel %vm632_vm5, %v3604_v58, %v2831_v55  ;;  %v2832_v5 = vadd.f32 -1.0, %v3005_v62  ;;  %v3007_v6 = vpop.eup %3006  ;;  %vm629_vm15 = vcmp.gt.f32.partialorder %v3624_v21, 0.0 }
 0x14d   : > { %v2903_v3 = vpack.c.bf16 %v712_v1, %v704_v54  ;;  %v711_v53 = vsel %vm631_vm6, %v3607_v59, %v2830_v61  ;;  %v3009_v58 = vpop.eup %3008  ;;  %v2825_v13 = vadd.f32 -1.0, %v3007_v6  ;;  %v718_v59 = vld [vmem:[%s4760_s2 + $0x20] sm:$0xff]  ;;  %vm637_vm1 = vcmp.gt.f32.partialorder %v3642_v40, 0.0 }
 0x14e   : > { %v2897_v7 = vpack.c.bf16 %v711_v53, %v703_v42  ;;  %v713_v11 = vsel %vm633_vm8, %v3613_v4, %v2832_v5  ;;  %v3011_v12 = vpop.eup %3010  ;;  %v2827_v15 = vadd.f32 -1.0, %v3009_v58  ;;  %vm1074_vm2 = vcmask 64512  }
 0x14f   : > { %v2901_v43 = vpack.c.bf16 %v713_v11, %v705_v10  ;;  %v706_v4 = vsel %vm626_vm9, %v3615_v8, %v2825_v13  ;;  %v2826_v25 = vadd.f32 -1.0, %v3011_v12 }
 0x150   : > { %2898 = vmatprep.subr.bf16.mxu0 %v2897_v7  ;;  %v3013_v14 = vpop.eup %3012  ;;  %v708_v24 = vsel %vm628_vm11, %v3617_v9, %v2827_v15 }
 0x151   : > { %2900 = vmatpush1.bf16.msra.mxu0 %v2899_v63  ;;  %2902 = vmatprep.subr.bf16.mxu1 %v2901_v43  ;;  %v3015_v16 = vpop.eup %3014  ;;  %v2833_v18 = vadd.f32 -1.0, %v3013_v14  ;;  %v707_v9 = vsel %vm627_vm13, %v3622_v17, %v2826_v25  ;;  %v723_v17 = vpop.permute.xlu1 %722 }
 0x152   : > { %2904 = vmatpush1.bf16.msra.mxu1 %v2903_v3  ;;  %v3017_v19 = vpop.eup %3016  ;;  %v2835_v46 = vadd.f32 -1.0, %v3015_v16 }
 0x153   : > { %v714_v20 = vsel %vm634_vm10, %v3627_v22, %v2833_v18  ;;  %v3019_v28 = vpop.eup %3018  ;;  %v2828_v29 = vadd.f32 -1.0, %v3017_v19  ;;  %v1060_v18 = vld [vmem:[%s4760_s2 + $0x28] sm:$0xff] }
 0x154   : > { %2837 = vmatmul.mubr.msk.f32.vlgmr.msra.gmra.mrb[8].mxu0 %vm307_vm0, %v718_v59  ;;  %v2907_v26 = vpack.c.bf16 %v714_v20, %v706_v4  ;;  %v716_v27 = vsel %vm636_vm12, %v3630_v23, %v2835_v46  ;;  %v3021_v8 = vpop.eup %3020  ;;  %v2834_v31 = vadd.f32 -1.0, %v3019_v28  ;;  %v1061_v20 = vld [vmem:[%s4760_s2 + $0x30] sm:$0xff] }
 0x155   : > { %934 = vmatprep.mubr.f32.mxu0 %v3303_v0  ;;  %2838 = vmatmul.mubr.msk.f32.vlgmr.msra.gmra.mrb[8].mxu1 %vm307_vm0, %v718_v59  ;;  %v2911_v30 = vpack.c.bf16 %v716_v27, %v708_v24  ;;  %v2836_v22 = vadd.f32 -1.0, %v3021_v8  ;;  %v709_v33 = vsel %vm629_vm15, %v3624_v21, %v2828_v29  ;;  %v3726_v8 = vld [vmem:[%s3505_s21 + $0x8] sm:$0xff] }
 0x156   : > { %1005 = vmatprep.mubr.f32.mxu1 %v3303_v0  ;;  %v715_v23 = vsel %vm635_vm14, %v3639_v34, %v2834_v31  ;;  %v269_v31 = vld [vmem:[%s3505_s21 + $0x48] sm:$0xff] }
 0x157   : > { %v2905_v32 = vpack.c.bf16 %v715_v23, %v707_v9  ;;  %v717_v35 = vsel %vm637_vm1, %v3642_v40, %v2836_v22  ;;  %v263_v22 = vld [vmem:[%s3505_s21 + $0x18] sm:$0xff] }
 0x158   : > { %v2909_v36 = vpack.c.bf16 %v717_v35, %v709_v33  ;;  %v271_v23 = vld [vmem:[%s3505_s21 + $0x58] sm:$0xff]  ;;  %v268_v33 = vld [vmem:[%s3505_s21 + $0x40] sm:$0xff] }
 0x159   : > { %2906 = vmatprep.subr.bf16.mxu0 %v2905_v32  ;;  %v260_v32 = vld [vmem:[%s3505_s21] sm:$0xff] }
 0x15a   : > { %2910 = vmatprep.subr.bf16.mxu1 %v2909_v36  ;;  %2908 = vmatpush1.bf16.msra.mxu0 %v2907_v26  ;;  %v262_v36 = vld [vmem:[%s3505_s21 + $0x10] sm:$0xff] }
 0x15b   : > { %2912 = vmatpush1.bf16.msra.mxu1 %v2911_v30 }
 0x15d   : > { %2839 = vmatmul.mubr.msk.f32.vlgmr.msra.gmra.mrb[10].mxu0 %vm307_vm0, %v718_v59 }
 0x15e   : > { %2840 = vmatmul.mubr.msk.f32.vlgmr.msra.gmra.mrb[10].mxu1 %vm307_vm0, %v718_v59  ;;  %1145 = vmatprep.mubr.f32.mxu0 %v3303_v0 }
 0x15f   : > { %1222 = vmatprep.mubr.f32.mxu1 %v3303_v0 }
 0x227   : > { %v794_v34 = vpop.f32.mrb[8].mxu0 }
 0x228   : > { %v795_v37 = vadd.f32 %v794_v34, %v723_v17  ;;  %v796_v38 = vpop.f32.mrb[9].mxu0  ;;  %v865_v21 = vpop.f32.mrb[8].mxu1 }
 0x229   : > { %v797_v41 = vadd.f32 %v796_v38, %v723_v17  ;;  %v866_v44 = vadd.f32 %v865_v21, %v723_v17  ;;  %v867_v45 = vpop.f32.mrb[9].mxu1  ;;  %v2913_v38 = vpack.c.bf16 %v269_v31, %v3726_v8 }
 0x22a   : > { %v1020_v40 = vmin.f32 %v795_v37, 0.0  ;;  %v868_v49 = vadd.f32 %v867_v45, %v723_v17  ;;  %vm1012_vm4 = vcmp.gt.f32.partialorder %v795_v37, 0.0  ;;  %v273_v45 = vld [vmem:[%s3505_s21 + $0x68] sm:$0xff] }
 0x22b   : > { %v1021_v48 = vmin.f32 %v797_v41, 0.0  ;;  %v1022_v50 = vmin.f32 %v866_v44, 0.0  ;;  %vm1013_vm3 = vcmp.gt.f32.partialorder %v797_v41, 0.0  ;;  %vm1014_vm6 = vcmp.gt.f32.partialorder %v866_v44, 0.0 }
 0x22c   : > { %v1028_v47 = vmul.f32 1.442695, %v1020_v40  ;;  %v1023_v52 = vmin.f32 %v868_v49, 0.0  ;;  %vm1015_vm5 = vcmp.gt.f32.partialorder %v868_v49, 0.0  ;;  %v2915_v40 = vpack.c.bf16 %v268_v33, %v260_v32 }
 0x22d   : > { %v1030_v51 = vmul.f32 1.442695, %v1021_v48  ;;  %v1032_v54 = vmul.f32 1.442695, %v1022_v50 }
 0x22e   : > { %3022 = vpow2.f32 %v1028_v47  ;;  %v1034_v55 = vmul.f32 1.442695, %v1023_v52  ;;  %v275_v47 = vld [vmem:[%s3505_s21 + $0x78] sm:$0xff]  ;;  %v264_v52 = vld [vmem:[%s3505_s21 + $0x20] sm:$0xff] }
 0x22f   : > { %3024 = vpow2.f32 %v1030_v51 }
 0x230   : > { %3026 = vpow2.f32 %v1032_v54  ;;  %v936_v56 = vpop.f32.mrb[10].mxu0  ;;  %v272_v54 = vld [vmem:[%s3505_s21 + $0x60] sm:$0xff] }
 0x231   : > { %3028 = vpow2.f32 %v1034_v55  ;;  %v3699_v57 = vadd.f32 %v936_v56, %v723_v17  ;;  %v1007_v60 = vpop.f32.mrb[10].mxu1  ;;  %v938_v61 = vpop.f32.mrb[11].mxu0  ;;  %v266_v55 = vld [vmem:[%s3505_s21 + $0x30] sm:$0xff] }
 0x232   : > { %v3701_v39 = vadd.f32 %v1007_v60, %v723_v17  ;;  %v3703_v62 = vadd.f32 %v938_v61, %v723_v17  ;;  %v1009_v63 = vpop.f32.mrb[11].mxu1  ;;  %v274_v56 = vld [vmem:[%s3505_s21 + $0x70] sm:$0xff]  ;;  %v2923_v60 = vpack.c.bf16 %v272_v54, %v264_v52 }
 0x233   : > { %v1024_v1 = vmin.f32 %v3699_v57, 0.0  ;;  %v3706_v2 = vadd.f32 %v1009_v63, %v723_v17  ;;  %vm1016_vm8 = vcmp.gt.f32.partialorder %v3699_v57, 0.0  ;;  %v270_v17 = vld [vmem:[%s3505_s21 + $0x50] sm:$0xff]  ;;  %v2927_v61 = vpack.c.bf16 %v274_v56, %v266_v55 }
 0x234   : > { %v1026_v3 = vmin.f32 %v3701_v39, 0.0  ;;  %v1025_v5 = vmin.f32 %v3703_v62, 0.0  ;;  %vm1017_vm7 = vcmp.gt.f32.partialorder %v3703_v62, 0.0  ;;  %vm1018_vm10 = vcmp.gt.f32.partialorder %v3701_v39, 0.0 }
 0x235   : > { %v1036_v6 = vmul.f32 1.442695, %v1024_v1  ;;  %v1027_v7 = vmin.f32 %v3706_v2, 0.0  ;;  %vm1019_vm9 = vcmp.gt.f32.partialorder %v3706_v2, 0.0  ;;  %v2919_v48 = vpack.c.bf16 %v270_v17, %v262_v36  ;;  %v3780_v1 = vpop.permute.xlu1 %1066 }
 0x236   : > { %v1040_v11 = vmul.f32 1.442695, %v1026_v3  ;;  %v1038_v43 = vmul.f32 1.442695, %v1025_v5  ;;  %v3785_v5 = vpop.permute.xlu0 %1071 }
 0x237   : > { %3030 = vpow2.f32 %v1036_v6  ;;  %v1042_v59 = vmul.f32 1.442695, %v1027_v7 }
 0x238   : > { %v3023_v42 = vpop.eup %3022  ;;  %3032 = vpow2.f32 %v1040_v11 }
 0x239   : > { %v3025_v53 = vpop.eup %3024  ;;  %v2841_v58 = vadd.f32 -1.0, %v3023_v42  ;;  %3034 = vpow2.f32 %v1038_v43 }
 0x23a   : > { %v3027_v10 = vpop.eup %3026  ;;  %v2842_v12 = vadd.f32 -1.0, %v3025_v53  ;;  %3036 = vpow2.f32 %v1042_v59 }
 0x23b   : > { %v3029_v13 = vpop.eup %3028  ;;  %v2843_v14 = vadd.f32 -1.0, %v3027_v10  ;;  %v1052_v19 = vsel %vm1012_vm4, %v795_v37, %v2841_v58 }
 0x23c   : > { %v1053_v15 = vsel %vm1013_vm3, %v797_v41, %v2842_v12  ;;  %v2844_v16 = vadd.f32 -1.0, %v3029_v13  ;;  %v2917_v41 = vpack.c.bf16 %v271_v23, %v263_v22 }
 0x23d   : > { %1081 = vmatprep.subr.mxu0 %v1053_v15  ;;  %v1054_v4 = vsel %vm1014_vm6, %v866_v44, %v2843_v14  ;;  %v265_v44 = vld [vmem:[%s3505_s21 + $0x28] sm:$0xff] }
 0x23e   : > { %v1055_v46 = vsel %vm1015_vm5, %v868_v49, %v2844_v16  ;;  %1082 = vmatpush1.msra.mxu0 %v1052_v19  ;;  %v267_v49 = vld [vmem:[%s3505_s21 + $0x38] sm:$0xff]  ;;  %v2921_v50 = vpack.c.bf16 %v273_v45, %v265_v44 }
 0x23f   : > { %1158 = vmatprep.subr.mxu1 %v1055_v46  ;;  %2849 = vmatmul.mubr.msk.f32.vlgmr.msra.gmra.mrb[12].mxu0 %vm1074_vm2, %v1060_v18  ;;  %v2925_v51 = vpack.c.bf16 %v275_v47, %v267_v49 }
 0x240   : > { %1159 = vmatpush1.msra.mxu1 %v1054_v4  ;;  %1151 = vmatprep.mubr.f32.mxu0 %v3303_v0 }
 0x241   : > { %2851 = vmatmul.mubr.msk.f32.vlgmr.msra.gmra.mrb[12].mxu1 %vm1074_vm2, %v1060_v18  ;;  %v3031_v24 = vpop.eup %3030 }
 0x242   : > { %1228 = vmatprep.mubr.f32.mxu1 %v3303_v0  ;;  %v3033_v25 = vpop.eup %3032  ;;  %v2845_v27 = vadd.f32 -1.0, %v3031_v24 }
 0x243   : > { %2850 = vmatmul.mubr.msk.f32.gmra.mrb[14].mxu0 %vm1074_vm2, %v1061_v20  ;;  %v3035_v26 = vpop.eup %3034  ;;  %v2847_v30 = vadd.f32 -1.0, %v3033_v25 }
 0x244   : > { %1299 = vmatprep.mubr.f32.mxu0 %v3303_v0  ;;  %v3037_v28 = vpop.eup %3036  ;;  %v2846_v29 = vadd.f32 -1.0, %v3035_v26  ;;  %v1056_v37 = vsel %vm1016_vm8, %v3699_v57, %v2845_v27  ;;  %v1705_v57 = vld [vmem:[%s4760_s2 + $0x10] sm:$0xff] }
 0x245   : > { %2852 = vmatmul.mubr.msk.f32.gmra.mrb[14].mxu1 %vm1074_vm2, %v1061_v20  ;;  %v2848_v9 = vadd.f32 -1.0, %v3037_v28  ;;  %v1058_v21 = vsel %vm1018_vm10, %v3701_v39, %v2847_v30  ;;  %v1706_v39 = vld [vmem:[%s4760_s2 + $0x18] sm:$0xff] }
 0x246   : > { %1376 = vmatprep.mubr.f32.mxu1 %v3303_v0  ;;  %v1057_v35 = vsel %vm1017_vm7, %v3703_v62, %v2846_v29 }
 0x247   : > { %1235 = vmatprep.subr.mxu0 %v1057_v35  ;;  %v1059_v34 = vsel %vm1019_vm9, %v3706_v2, %v2848_v9 }
 0x248   : > { %1312 = vmatprep.subr.mxu1 %v1059_v34  ;;  %1236 = vmatpush1.msra.mxu0 %v1056_v37 }
 0x249   : > { %1313 = vmatpush1.msra.mxu1 %v1058_v21  ;;  %2853 = vmatmul.mubr.msk.f32.vlgmr.msra.gmra.mrb[16].mxu0 %vm1074_vm2, %v1060_v18 }
 0x24a   : > { %2855 = vmatmul.mubr.msk.f32.vlgmr.msra.gmra.mrb[16].mxu1 %vm1074_vm2, %v1060_v18  ;;  %1305 = vmatprep.mubr.f32.mxu0 %v3303_v0 }
 0x24b   : > { %1382 = vmatprep.mubr.f32.mxu1 %v3303_v0  ;;  %2914 = vmatprep.subr.bf16.mxu0 %v2913_v38 }
 0x24c   : > { %2918 = vmatprep.subr.bf16.mxu1 %v2917_v41  ;;  %2916 = vmatpush1.bf16.msra.mxu0 %v2915_v40 }
 0x24d   : > { %2854 = vmatmul.mubr.msk.f32.gmra.mrb[18].mxu0 %vm1074_vm2, %v1061_v20  ;;  %2920 = vmatpush1.bf16.msra.mxu1 %v2919_v48 }
 0x24e   : > { %2856 = vmatmul.mubr.msk.f32.gmra.mrb[18].mxu1 %vm1074_vm2, %v1061_v20  ;;  %1789 = vmatprep.mubr.f32.mxu0 %v3303_v0 }
 0x24f   : > { %1866 = vmatprep.mubr.f32.mxu1 %v3303_v0  ;;  %2922 = vmatprep.subr.bf16.mxu0 %v2921_v50 }
 0x250   : > { %2926 = vmatprep.subr.bf16.mxu1 %v2925_v51 }
 0x251   : > { %2857 = vmatmul.mubr.msk.f32.vlgmr.msra.gmra.mrb[20].mxu0 %vm307_vm0, %v1705_v57 }
 0x252   : > { %2859 = vmatmul.mubr.msk.f32.vlgmr.msra.gmra.mrb[20].mxu1 %vm307_vm0, %v1705_v57  ;;  %1795 = vmatprep.mubr.f32.mxu0 %v3303_v0 }
 0x253   : > { %1872 = vmatprep.mubr.f32.mxu1 %v3303_v0  ;;  %2924 = vmatpush1.bf16.msra.mxu0 %v2923_v60 }
 0x254   : > { %2928 = vmatpush1.bf16.msra.mxu1 %v2927_v61 }
 0x255   : > { %2858 = vmatmul.mubr.msk.f32.gmra.mrb[22].mxu0 %vm307_vm0, %v1706_v39 }
 0x256   : > { %2860 = vmatmul.mubr.msk.f32.gmra.mrb[22].mxu1 %vm307_vm0, %v1706_v39  ;;  %1943 = vmatprep.mubr.f32.mxu0 %v3303_v0 }
 0x257   : > { %2020 = vmatprep.mubr.f32.mxu1 %v3303_v0 }
 0x259   : > { %2861 = vmatmul.mubr.msk.f32.vlgmr.msra.gmra.mrb[24].mxu0 %vm307_vm0, %v1705_v57 }
 0x25a   : > { %2863 = vmatmul.mubr.msk.f32.vlgmr.msra.gmra.mrb[24].mxu1 %vm307_vm0, %v1705_v57  ;;  %1949 = vmatprep.mubr.f32.mxu0 %v3303_v0 }
 0x25b   : > { %2026 = vmatprep.mubr.f32.mxu1 %v3303_v0 }
 0x25d   : > { %2862 = vmatmul.mubr.msk.f32.gmra.mrb[26].mxu0 %vm307_vm0, %v1706_v39 }
 0x25e   : > { %2864 = vmatmul.mubr.msk.f32.gmra.mrb[26].mxu1 %vm307_vm0, %v1706_v39 }
 0x312   : > { %v1147_v62 = vpop.f32.mrb[12].mxu0 }
 0x313   : > { %v1149_v63 = vpop.f32.mrb[13].mxu0  ;;  %v3783_v42 = vadd.f32 %v1147_v62, %v3780_v1 }
 0x314   : > { %v1224_v2 = vpop.f32.mrb[12].mxu1  ;;  %v3788_v53 = vadd.f32 %v1149_v63, %v3780_v1 }
 0x315   : > { %v1226_v3 = vpop.f32.mrb[13].mxu1  ;;  %v3791_v0 = vadd.f32 %v1224_v2, %v3780_v1  ;;  %v1389_v12 = vmul.f32 %v3783_v42, %v3783_v42 }
 0x316   : > { %v1153_v6 = vpop.f32.mrb[14].mxu0  ;;  %v3797_v10 = vadd.f32 %v1226_v3, %v3780_v1  ;;  %v1390_v15 = vmul.f32 %v3788_v53, %v3788_v53 }
 0x317   : > { %v3794_v7 = vadd.f32 %v1153_v6, %v3785_v5  ;;  %v1155_v58 = vpop.f32.mrb[15].mxu0  ;;  %v1391_v19 = vmul.f32 %v3791_v0, %v3791_v0 }
 0x318   : > { %v1230_v11 = vpop.f32.mrb[14].mxu1  ;;  %v3800_v43 = vadd.f32 %v1155_v58, %v3785_v5  ;;  %v1392_v20 = vmul.f32 %v3797_v10, %v3797_v10 }
 0x319   : > { %v1397_v13 = vmul.f32 %v3794_v7, %v3794_v7  ;;  %v3807_v59 = vadd.f32 %v1230_v11, %v3785_v5  ;;  %v1232_v14 = vpop.f32.mrb[15].mxu1 }
 0x31a   : > { %v1398_v16 = vmul.f32 %v3800_v43, %v3800_v43  ;;  %v3814_v18 = vadd.f32 %v1232_v14, %v3785_v5 }
 0x31b   : > { %v1405_v46 = vadd.f32 %v1397_v13, %v1389_v12  ;;  %v1399_v4 = vmul.f32 %v3807_v59, %v3807_v59 }
 0x31c   : > { %v1412_v24 = vadd.f32 %v1398_v16, %v1390_v15  ;;  %v1400_v25 = vmul.f32 %v3814_v18, %v3814_v18  ;;  %v1301_v23 = vpop.f32.mrb[16].mxu0 }
 0x31d   : > { %v1406_v26 = vrot.slane %v1405_v46, 4  ;;  %v1419_v27 = vadd.f32 %v1399_v4, %v1391_v19  ;;  %v3825_v35 = vadd.f32 %v1301_v23, %v3780_v1  ;;  %v1378_v36 = vpop.f32.mrb[16].mxu1  ;;  %v1303_v17 = vpop.f32.mrb[17].mxu0 }
 0x31e   : > { %v1413_v28 = vrot.slane %v1412_v24, 4  ;;  %v1426_v29 = vadd.f32 %v1400_v25, %v1392_v20  ;;  %v3828_v38 = vadd.f32 %v1378_v36, %v3780_v1  ;;  %v1380_v21 = vpop.f32.mrb[17].mxu1  ;;  %v3831_v44 = vadd.f32 %v1303_v17, %v3780_v1 }
 0x31f   : > { %v1407_v30 = vadd.f32 %v1406_v26, %v1405_v46  ;;  %v1420_v31 = vrot.slane %v1419_v27, 4  ;;  %v1393_v49 = vmul.f32 %v3825_v35, %v3825_v35  ;;  %v3890_v17 = vmul.f32 2.0, %v3726_v8 }
 0x320   : > { %v1414_v22 = vadd.f32 %v1413_v28, %v1412_v24  ;;  %v1427_v9 = vrot.slane %v1426_v29, 4  ;;  %4779 = vst [vmem:[#allocation12_spill] sm:$0xff] %v3831_v44  ;;  %v1307_v47 = vpop.f32.mrb[18].mxu0  ;;  %v1395_v52 = vmul.f32 %v3828_v38, %v3828_v38  ;;  %v1394_v3 = vmul.f32 %v3831_v44, %v3831_v44 }
 0x321   : > { %v1408_v32 = vrot.slane %v1407_v30, 2  ;;  %v1421_v33 = vadd.f32 %v1420_v31, %v1419_v27  ;;  %v3838_v54 = vadd.f32 %v1307_v47, %v3785_v5  ;;  %v1384_v55 = vpop.f32.mrb[18].mxu1  ;;  %v1309_v56 = vpop.f32.mrb[19].mxu0  ;;  %v3871_v28 = vadd.f32 %v1380_v21, %v3780_v1  ;;  %4783 = vst [vmem:[#allocation16_spill] sm:$0xff] %v3890_v17 }
 0x322   : > { %v1415_v34 = vrot.slane %v1414_v22, 2  ;;  %v1428_v37 = vadd.f32 %v1427_v9, %v1426_v29  ;;  %v3841_v61 = vadd.f32 %v1384_v55, %v3785_v5  ;;  %v3844_v39 = vadd.f32 %v1309_v56, %v3785_v5  ;;  %v1386_v62 = vpop.f32.mrb[19].mxu1 }
 0x323   : > { %v1409_v41 = vadd.f32 %v1408_v32, %v1407_v30  ;;  %v1422_v40 = vrot.slane %v1421_v33, 2  ;;  %v1401_v6 = vmul.f32 %v3838_v54, %v3838_v54  ;;  %v3859_v46 = vadd.f32 %v1386_v62, %v3785_v5  ;;  %4782 = vst [vmem:[#allocation15_spill] sm:$0xff] %v3871_v28 }
 0x324   : > { %v1416_v45 = vadd.f32 %v1415_v34, %v1414_v22  ;;  %v1429_v48 = vrot.slane %v1428_v37, 2  ;;  %4780 = vst [vmem:[#allocation13_spill] sm:$0xff] %v3844_v39  ;;  %v1403_v12 = vmul.f32 %v3841_v61, %v3841_v61  ;;  %v1402_v13 = vmul.f32 %v3844_v39, %v3844_v39  ;;  %v3854_v14 = vpop.f32.mrb[20].mxu0 }
 0x325   : > { %v1410_v50 = vrot.slane %v1409_v41, 1  ;;  %v1423_v51 = vadd.f32 %v1422_v40, %v1421_v33  ;;  %v1433_v19 = vadd.f32 %v1401_v6, %v1393_v49  ;;  %4781 = vst [vmem:[#allocation14_spill] sm:$0xff] %v3859_v46  ;;  %v3861_v4 = vpop.f32.mrb[20].mxu1  ;;  %v3863_v20 = vpop.f32.mrb[21].mxu0  ;;  %v1404_v30 = vmul.f32 %v3859_v46, %v3859_v46 }
 0x326   : > { %v1417_v57 = vrot.slane %v1416_v45, 1  ;;  %v1430_v60 = vadd.f32 %v1429_v48, %v1428_v37  ;;  %v1447_v25 = vadd.f32 %v1403_v12, %v1395_v52  ;;  %v1440_v26 = vadd.f32 %v1402_v13, %v1394_v3  ;;  %v3867_v27 = vpop.f32.mrb[21].mxu1 }
 0x327   : > { %v1411_v63 = vadd.f32 %v1410_v50, %v1409_v41  ;;  %v1424_v2 = vrot.slane %v1423_v51, 1  ;;  %v1396_v1 = vmul.f32 %v3871_v28, %v3871_v28  ;;  %v1434_v23 = vrot.slane %v1433_v19, 4 }
 0x328   : > { %v1418_v58 = vadd.f32 %v1417_v57, %v1416_v45  ;;  %v1431_v11 = vrot.slane %v1430_v60, 1  ;;  %v3878_v31 = vpop.f32.mrb[22].mxu0  ;;  %v1448_v33 = vrot.slane %v1447_v25, 4  ;;  %v1441_v36 = vrot.slane %v1440_v26, 4 }
 0x329   : > { %v3856_v15 = vmax.f32 %v1411_v63, 1e-08  ;;  %v1425_v16 = vadd.f32 %v1424_v2, %v1423_v51  ;;  %v3881_v22 = vpop.f32.mrb[22].mxu1  ;;  %v3883_v9 = vpop.f32.mrb[23].mxu0  ;;  %v1435_v37 = vadd.f32 %v1434_v23, %v1433_v19  ;;  %v1454_v21 = vadd.f32 %v1404_v30, %v1396_v1 }
 0x32a   : > { %v3865_v24 = vmax.f32 %v1418_v58, 1e-08  ;;  %v1432_v5 = vadd.f32 %v1431_v11, %v1430_v60  ;;  %v3893_v41 = vpop.f32.mrb[23].mxu1  ;;  %v1449_v51 = vadd.f32 %v1448_v33, %v1447_v25  ;;  %v1442_v52 = vadd.f32 %v1441_v36, %v1440_v26 }
 0x32b   : > { %3038 = vrsqrt.f32 %v3856_v15  ;;  %v3873_v29 = vmax.f32 %v1425_v16, 1e-08  ;;  %v1621_v34 = vmul.f32 0.16666667, %v3856_v15  ;;  %vm1471_vm0 = vcmp.eq.f32.partialorder %v3856_v15, inf }
 0x32c   : > { %3040 = vrsqrt.f32 %v3865_v24  ;;  %v3887_v32 = vmax.f32 %v1432_v5, 1e-08  ;;  %v3895_v40 = vpop.f32.mrb[24].mxu0  ;;  %vm1473_vm11 = vcmp.eq.f32.partialorder %v3856_v15, 0.0  ;;  %v1474_v8 = vand.u32 2147483648, %v3856_v15 }
 0x32d   : > { %3042 = vrsqrt.f32 %v3873_v29  ;;  %v3900_v48 = vpop.f32.mrb[24].mxu1  ;;  %v3902_v49 = vpop.f32.mrb[25].mxu0  ;;  %vm1478_vm12 = vcmp.eq.f32.partialorder %v3865_v24, inf  ;;  %vm1480_vm13 = vcmp.eq.f32.partialorder %v3865_v24, 0.0  ;;  %v1436_v47 = vrot.slane %v1435_v37, 2 }
 0x32e   : > { %3044 = vrsqrt.f32 %v3887_v32  ;;  %v1481_v50 = vand.u32 2147483648, %v3865_v24  ;;  %v1455_v55 = vrot.slane %v1454_v21, 4  ;;  %v3908_v56 = vpop.f32.mrb[25].mxu1  ;;  %v3914_v62 = vadd.f32 1.0, %v1621_v34 }
 0x32f   : > { %vm1485_vm14 = vcmp.eq.f32.partialorder %v3873_v29, inf  ;;  %vm1487_vm15 = vcmp.eq.f32.partialorder %v3873_v29, 0.0  ;;  %v1437_v63 = vadd.f32 %v1436_v47, %v1435_v37  ;;  %v1488_v11 = vand.u32 2147483648, %v3873_v29 }
 0x330   : > { %v3910_v57 = vpop.f32.mrb[26].mxu0  ;;  %v1450_v12 = vrot.slane %v1449_v51, 2  ;;  %v1443_v13 = vrot.slane %v1442_v52, 2  ;;  %v1623_v19 = vmul.f32 0.16666667, %v3873_v29  ;;  %v1456_v5 = vadd.f32 %v1455_v55, %v1454_v21 }
 0x331   : > { %4784 = vst [vmem:[#allocation17_spill] sm:$0xff] %v3910_v57  ;;  %v3918_v2 = vpop.f32.mrb[26].mxu1  ;;  %v3920_v3 = vpop.f32.mrb[27].mxu0  ;;  %v1438_v26 = vrot.slane %v1437_v63, 1  ;;  %v1622_v23 = vmul.f32 0.16666667, %v3865_v24 }
 0x332   : > { %4785 = vst [vmem:[#allocation18_spill] sm:$0xff] %v3918_v2  ;;  %4786 = vst [vmem:[#allocation19_spill] sm:$0xff] %v3920_v3  ;;  %v3927_v16 = vpop.f32.mrb[27].mxu1  ;;  %v1451_v33 = vadd.f32 %v1450_v12, %v1449_v51  ;;  %v1444_v36 = vadd.f32 %v1443_v13, %v1442_v52  ;;  %v1457_v12 = vrot.slane %v1456_v5, 2  ;;  %vm1492_vm1 = vcmp.eq.f32.partialorder %v3887_v32, inf }
 0x333   : > { %4787 = vst [vmem:[#allocation20_spill] sm:$0xff] %v3927_v16  ;;  %v1439_v47 = vadd.f32 %v1438_v26, %v1437_v63  ;;  %v3961_v16 = vpop.permute.xlu0 %1670  ;;  %vm1494_vm2 = vcmp.eq.f32.partialorder %v3887_v32, 0.0  ;;  %vm1613_vm3 = vcmp.lt.f32.partialorder %v3856_v15, 1e-06  ;;  %vm1614_vm4 = vcmp.lt.f32.partialorder %v3865_v24, 1e-06 }
 0x334   : > { %v1452_v17 = vrot.slane %v1451_v33, 1  ;;  %vm1615_vm7 = vcmp.lt.f32.partialorder %v3873_v29, 1e-06 }
 0x335   : > { %v3912_v60 = vpop.eup %3038 }
 0x336   : > { %v3922_v6 = vpop.eup %3040  ;;  %v1470_v58 = vmul.f32 %v3912_v60, %v3856_v15  ;;  %v1453_v26 = vadd.f32 %v1452_v17, %v1451_v33  ;;  %v1495_v17 = vand.u32 2147483648, %v3887_v32  ;;  %v1624_v33 = vmul.f32 0.16666667, %v3887_v32 }
 0x337   : > { %v1477_v25 = vmul.f32 %v3922_v6, %v3865_v24  ;;  %v3932_v30 = vpop.eup %3042 }
 0x338   : > { %v1472_v1 = vsel %vm1471_vm0, %v3856_v15, %v1470_v58  ;;  %v1484_v37 = vmul.f32 %v3932_v30, %v3873_v29  ;;  %v3950_v13 = vpop.eup %3044  ;;  %vm1616_vm0 = vcmp.lt.f32.partialorder %v3887_v32, 1e-06 }
 0x339   : > { %v1475_v34 = vsel %vm1473_vm11, %v1474_v8, %v1472_v1  ;;  %v1479_v21 = vsel %vm1478_vm12, %v3865_v24, %v1477_v25  ;;  %v3952_v1 = vpop.permute.xlu1 %1665 }
 0x33a   : > { %v1525_v55 = vmul.f32 1.442695, %v1475_v34  ;;  %v1541_v45 = vsub.f32 0.0, %v1475_v34  ;;  %v1482_v58 = vsel %vm1480_vm13, %v1481_v50, %v1479_v21  ;;  %v1486_v51 = vsel %vm1485_vm14, %v3873_v29, %v1484_v37 }
 0x33b   : > { %v1527_v52 = vmul.f32 1.442695, %v1482_v58  ;;  %v1542_v8 = vsub.f32 0.0, %v1482_v58  ;;  %v1489_v63 = vsel %vm1487_vm15, %v1488_v11, %v1486_v51  ;;  %v1491_v37 = vmul.f32 %v3950_v13, %v3887_v32 }
 0x33c   : > { %3046 = vpow2.f32 %v1525_v55  ;;  %v1549_v25 = vmul.f32 1.442695, %v1541_v45  ;;  %v1529_v34 = vmul.f32 1.442695, %v1489_v63  ;;  %v1543_v50 = vsub.f32 0.0, %v1489_v63 }
 0x33d   : > { %3048 = vpow2.f32 %v1527_v52  ;;  %v1551_v21 = vmul.f32 1.442695, %v1542_v8  ;;  %v3959_v58 = vmax.f32 %v1439_v47, 1e-08  ;;  %v1493_v11 = vsel %vm1492_vm1, %v3887_v32, %v1491_v37  ;;  %v1712_v8 = vpop.permute.xlu1 %1711 }
 0x33e   : > { %3050 = vpow2.f32 %v1549_v25  ;;  %v1553_v45 = vmul.f32 1.442695, %v1543_v50  ;;  %v3967_v55 = vmax.f32 %v1453_v26, 1e-08  ;;  %v1496_v51 = vsel %vm1494_vm2, %v1495_v17, %v1493_v11 }
 0x33f   : > { %3052 = vpow2.f32 %v1529_v34  ;;  %v1445_v52 = vrot.slane %v1444_v36, 1  ;;  %v1458_v47 = vadd.f32 %v1457_v12, %v1456_v5  ;;  %v3969_v25 = vadd.f32 1.0, %v1623_v19  ;;  %v3987_v12 = vpop.permute.xlu0 %1716 }
 0x340   : > { %3054 = vpow2.f32 %v1551_v21  ;;  %v1531_v63 = vmul.f32 1.442695, %v1496_v51  ;;  %v1544_v34 = vsub.f32 0.0, %v1496_v51  ;;  %v3972_v50 = vadd.f32 1.0, %v1622_v23  ;;  %4788 = vst [vmem:[#allocation21_spill] sm:$0xff] %v3987_v12 }
 0x341   : > { %3056 = vpow2.f32 %v1553_v45  ;;  %v3976_v21 = vadd.f32 %v3854_v14, %v1712_v8  ;;  %v3979_v26 = vadd.f32 %v3861_v4, %v1712_v8  ;;  %v3981_v45 = vadd.f32 1.0, %v1624_v33 }
 0x342   : > { %3058 = vrsqrt.f32 %v3959_v58  ;;  %v1555_v37 = vmul.f32 1.442695, %v1544_v34  ;;  %v1625_v19 = vmul.f32 0.16666667, %v3959_v58  ;;  %v3985_v5 = vadd.f32 %v3863_v20, %v1712_v8 }
 0x343   : > { %3060 = vrsqrt.f32 %v3967_v55  ;;  %v1446_v23 = vadd.f32 %v1445_v52, %v1444_v36  ;;  %v1459_v17 = vrot.slane %v1458_v47, 1  ;;  %v3990_v11 = vadd.f32 %v3867_v27, %v1712_v8 }
 0x344   : > { %3062 = vpow2.f32 %v1531_v63  ;;  %v1627_v4 = vmul.f32 0.16666667, %v3967_v55  ;;  %v3996_v33 = vadd.f32 %v3878_v31, %v3987_v12  ;;  %v4000_v20 = vadd.f32 %v3881_v22, %v3987_v12 }
 0x345   : > { %3064 = vpow2.f32 %v1555_v37  ;;  %v4002_v36 = vmax.f32 %v1446_v23, 1e-08  ;;  %v1460_v52 = vadd.f32 %v1459_v17, %v1458_v47  ;;  %v4005_v27 = vadd.f32 %v3902_v49, %v1712_v8 }
 0x346   : > { %v3047_v14 = vpop.eup %3046  ;;  %v4008_v63 = vadd.f32 %v3908_v56, %v1712_v8  ;;  %vm1499_vm5 = vcmp.eq.f32.partialorder %v3959_v58, inf  ;;  %vm1501_vm6 = vcmp.eq.f32.partialorder %v3959_v58, 0.0  ;;  %v1502_v31 = vand.u32 2147483648, %v3959_v58 }
 0x347   : > { %v3049_v51 = vpop.eup %3048  ;;  %4789 = vst [vmem:[#allocation22_spill] sm:$0xff] %v4005_v27  ;;  %v4014_v22 = vadd.f32 1.0, %v1625_v19  ;;  %vm1513_vm8 = vcmp.eq.f32.partialorder %v3967_v55, inf  ;;  %v1516_v49 = vand.u32 2147483648, %v3967_v55  ;;  %3066 = vrsqrt.f32 %v4002_v36 }
 0x348   : > { %4790 = vst [vmem:[#allocation23_spill] sm:$0xff] %v4008_v63  ;;  %v3051_v34 = vpop.eup %3050  ;;  %v4020_v47 = vadd.f32 1.0, %v1627_v4  ;;  %v4024_v3 = vadd.f32 %v3883_v9, %v3987_v12  ;;  %v4028_v19 = vadd.f32 %v3893_v41, %v3987_v12  ;;  %vm1515_vm9 = vcmp.eq.f32.partialorder %v3967_v55, 0.0 }
 0x349   : > { %v3053_v37 = vpop.eup %3052  ;;  %v1581_v23 = vsub.f32 %v3047_v14, %v3051_v34  ;;  %v1565_v17 = vadd.f32 %v3051_v34, %v3047_v14  ;;  %v4031_v57 = vmax.f32 %v1460_v52, 1e-08  ;;  %v4034_v46 = vadd.f32 %v3895_v40, %v1712_v8 }
 0x34a   : > { %v3055_v56 = vpop.eup %3054  ;;  %4791 = vst [vmem:[#allocation24_spill] sm:$0xff] %v4028_v19  ;;  %v1509_v9 = vand.u32 2147483648, %v4002_v36  ;;  %v4040_v34 = vmul.f32 0.16666667, %v4002_v36  ;;  %v4043_v41 = vadd.f32 %v3900_v48, %v1712_v8  ;;  %vm1506_vm10 = vcmp.eq.f32.partialorder %v4002_v36, inf }
 0x34b   : > { %v3057_v63 = vpop.eup %3056  ;;  %v1589_v2 = vmul.f32 0.5, %v1581_v23  ;;  %v1582_v27 = vsub.f32 %v3049_v51, %v3055_v56  ;;  %4792 = vst [vmem:[#allocation25_spill] sm:$0xff] %v4034_v46  ;;  %3068 = vrsqrt.f32 %v4031_v57  ;;  %vm1508_vm11 = vcmp.eq.f32.partialorder %v4002_v36, 0.0 }
 0x34c   : > { %v4036_v4 = vpop.eup %3058  ;;  %v1583_v14 = vsub.f32 %v3053_v37, %v3057_v63  ;;  %4793 = vst [vmem:[#allocation26_spill] sm:$0xff] %v4043_v41  ;;  %v1573_v48 = vmul.f32 0.5, %v1565_v17  ;;  %v1566_v8 = vadd.f32 %v3055_v56, %v3049_v51  ;;  %vm1520_vm12 = vcmp.eq.f32.partialorder %v4031_v57, inf }
 0x34d   : > { %v4045_v23 = vpop.eup %3060  ;;  %v1605_v12 = vmul.f32 %v3912_v60, %v1589_v2  ;;  %v1590_v52 = vmul.f32 0.5, %v1582_v27  ;;  %v1498_v40 = vmul.f32 %v4036_v4, %v3959_v58  ;;  %vm1522_vm13 = vcmp.eq.f32.partialorder %v4031_v57, 0.0 }
 0x34e   : > { %v1591_v46 = vmul.f32 0.5, %v1583_v14  ;;  %v1512_v28 = vmul.f32 %v4045_v23, %v3967_v55  ;;  %v3063_v41 = vpop.eup %3062  ;;  %v1567_v14 = vadd.f32 %v3057_v63, %v3053_v37  ;;  %v1673_v37 = vmul.f32 %v3952_v1, %v1573_v48 }
 0x34f   : > { %v1637_v60 = vsel %vm1613_vm3, %v3914_v62, %v1605_v12  ;;  %v1606_v2 = vmul.f32 %v3922_v6, %v1590_v52  ;;  %v1500_v27 = vsel %vm1499_vm5, %v3959_v58, %v1498_v40  ;;  %v3065_v39 = vpop.eup %3064  ;;  %vm1617_vm14 = vcmp.lt.f32.partialorder %v3959_v58, 1e-06 }
 0x350   : > { %v1645_v44 = vmul.f32 %v1637_v60, %v3783_v42  ;;  %v1653_v19 = vmul.f32 %v1637_v60, %v3794_v7  ;;  %v1607_v17 = vmul.f32 %v3932_v30, %v1591_v46  ;;  %v1503_v51 = vsel %vm1501_vm6, %v1502_v31, %v1500_v27 }
 0x351   : > { %v1638_v15 = vsel %vm1614_vm4, %v3972_v50, %v1606_v2  ;;  %v1584_v62 = vsub.f32 %v3063_v41, %v3065_v39  ;;  %v1533_v6 = vmul.f32 1.442695, %v1503_v51  ;;  %v1545_v12 = vsub.f32 0.0, %v1503_v51  ;;  %v4081_v30 = vpop.eup %3066 }
 0x352   : > { %v1639_v63 = vsel %vm1615_vm7, %v3969_v25, %v1607_v17  ;;  %v1646_v42 = vmul.f32 %v1638_v15, %v3788_v53  ;;  %v4076_v7 = vmul.f32 %v1638_v15, %v3800_v43  ;;  %v1514_v46 = vsel %vm1513_vm8, %v3967_v55, %v1512_v28 }
 0x353   : > { %v1647_v24 = vmul.f32 %v1639_v63, %v3791_v0  ;;  %v4085_v50 = vmul.f32 %v1639_v63, %v3807_v59  ;;  %v1592_v31 = vmul.f32 0.5, %v1584_v62  ;;  %v1557_v29 = vmul.f32 1.442695, %v1545_v12 }
 0x354   : > { %v1517_v53 = vsel %vm1515_vm9, %v1516_v49, %v1514_v46  ;;  %v1505_v43 = vmul.f32 %v4081_v30, %v4002_v36  ;;  %3070 = vpow2.f32 %v1533_v6  ;;  %v1575_v56 = vmul.f32 0.5, %v1567_v14 }
 0x355   : > { %v1608_v28 = vmul.f32 %v3950_v13, %v1592_v31  ;;  %v1537_v25 = vmul.f32 1.442695, %v1517_v53  ;;  %v1547_v0 = vsub.f32 0.0, %v1517_v53  ;;  %3072 = vpow2.f32 %v1557_v29  ;;  %v4098_v52 = vpop.eup %3068 }
 0x356   : > { %v1507_v59 = vsel %vm1506_vm10, %v4002_v36, %v1505_v43  ;;  %v1519_v14 = vmul.f32 %v4098_v52, %v4031_v57  ;;  %v1523_v51 = vand.u32 2147483648, %v4031_v57  ;;  %v1689_v32 = vadd.f32 %v1673_v37, %v1645_v44 }
 0x357   : > { %v1640_v49 = vsel %vm1616_vm0, %v3981_v45, %v1608_v28  ;;  %3074 = vpow2.f32 %v1537_v25  ;;  %v1561_v40 = vmul.f32 1.442695, %v1547_v0  ;;  %v1510_v13 = vsel %vm1508_vm11, %v1509_v9, %v1507_v59 }
 0x358   : > { %v1648_v60 = vmul.f32 %v1640_v49, %v3797_v10  ;;  %v4107_v2 = vmul.f32 %v1640_v49, %v3814_v18  ;;  %v1535_v27 = vmul.f32 1.442695, %v1510_v13  ;;  %v1546_v17 = vsub.f32 0.0, %v1510_v13 }
 0x359   : > { %3076 = vpow2.f32 %v1561_v40  ;;  %v1675_v15 = vmul.f32 %v3952_v1, %v1575_v56  ;;  %v1574_v62 = vmul.f32 0.5, %v1566_v8  ;;  %v1521_v10 = vsel %vm1520_vm12, %v4031_v57, %v1519_v14 }
 0x35a   : > { %3078 = vpow2.f32 %v1535_v27  ;;  %v1559_v45 = vmul.f32 1.442695, %v1546_v17  ;;  %v4117_v18 = vadd.f32 %v3976_v21, %v1689_v32  ;;  %v1568_v9 = vadd.f32 %v3065_v39, %v3063_v41 }
 0x35b   : > { %v1681_v6 = vmul.f32 %v3961_v16, %v1573_v48  ;;  %v1524_v12 = vsel %vm1522_vm13, %v1523_v51, %v1521_v10  ;;  %v1691_v44 = vadd.f32 %v1675_v15, %v1647_v24  ;;  %v1674_v63 = vmul.f32 %v3952_v1, %v1574_v62 }
 0x35c   : > { %3080 = vpow2.f32 %v1559_v45  ;;  %v1539_v46 = vmul.f32 1.442695, %v1524_v12  ;;  %v1548_v31 = vsub.f32 0.0, %v1524_v12  ;;  %v1628_v8 = vmul.f32 0.16666667, %v4031_v57 }
 0x35d   : > { %v1576_v29 = vmul.f32 0.5, %v1568_v9  ;;  %v2121_v21 = vmul.f32 2.0, %v4117_v18  ;;  %v4127_v39 = vadd.f32 %v3979_v26, %v1691_v44  ;;  %v1690_v41 = vadd.f32 %v1674_v63, %v1646_v42 }
 0x35e   : > { %v1697_v48 = vadd.f32 %v1681_v6, %v1653_v19  ;;  %v3071_v53 = vpop.eup %3070  ;;  %3082 = vpow2.f32 %v1539_v46  ;;  %v1563_v43 = vmul.f32 1.442695, %v1548_v31  ;;  %v2049_v28 = vmul.f32 %v4117_v18, %v4117_v18 }
 0x35f   : > { %v1676_v24 = vmul.f32 %v3952_v1, %v1576_v29  ;;  %v3073_v25 = vpop.eup %3072  ;;  %v2123_v0 = vmul.f32 2.0, %v4127_v39  ;;  %v4134_v59 = vadd.f32 %v3985_v5, %v1690_v41  ;;  %v1683_v26 = vmul.f32 %v3961_v16, %v1575_v56 }
 0x360   : > { %v4137_v37 = vadd.f32 %v3996_v33, %v1697_v48  ;;  %v1585_v42 = vsub.f32 %v3071_v53, %v3073_v25  ;;  %vm1619_vm15 = vcmp.lt.f32.partialorder %v3967_v55, 1e-06  ;;  %v1634_v49 = vadd.f32 1.0, %v4040_v34 }
 0x361   : > { %v3075_v19 = vpop.eup %3074  ;;  %3084 = vpow2.f32 %v1563_v43  ;;  %v1692_v40 = vadd.f32 %v1676_v24, %v1648_v60  ;;  %v4142_v13 = vadd.f32 1.0, %v1628_v8  ;;  %v4145_v27 = vmul.f32 %v2121_v21, %v4117_v18 }
 0x362   : > { %v2057_v5 = vmul.f32 %v4137_v37, %v4137_v37  ;;  %v1699_v33 = vadd.f32 %v1683_v26, %v4085_v50  ;;  %v1593_v56 = vmul.f32 0.5, %v1585_v42  ;;  %v2051_v34 = vmul.f32 %v4127_v39, %v4127_v39 }
 0x363   : > { %v3077_v17 = vpop.eup %3076  ;;  %v4151_v14 = vadd.f32 %v3990_v11, %v1692_v40  ;;  %v1682_v60 = vmul.f32 %v3961_v16, %v1574_v62  ;;  %vm1618_vm1 = vcmp.lt.f32.partialorder %v4002_v36, 1e-06  ;;  %v4158_v45 = vmul.f32 %v2123_v0, %v4127_v39 }
 0x364   : > { %v3079_v51 = vpop.eup %3078  ;;  %v1587_v32 = vsub.f32 %v3075_v19, %v3077_v17  ;;  %v2065_v15 = vadd.f32 %v2057_v5, %v2049_v28  ;;  %v4161_v50 = vadd.f32 %v4000_v20, %v1699_v33  ;;  %v1609_v10 = vmul.f32 %v4036_v4, %v1593_v56 }
 0x365   : > { %v4165_v11 = vmul.f32 2.0, %v4134_v59  ;;  %v1698_v9 = vadd.f32 %v1682_v60, %v4076_v7  ;;  %v2050_v62 = vmul.f32 %v4134_v59, %v4134_v59  ;;  %v1684_v46 = vmul.f32 %v3961_v16, %v1576_v29 }
 0x366   : > { %v3081_v6 = vpop.eup %3080  ;;  %v1595_v12 = vmul.f32 0.5, %v1587_v32  ;;  %v2066_v44 = vrot.slane %v2065_v15, 4  ;;  %v2059_v63 = vmul.f32 %v4161_v50, %v4161_v50  ;;  %v1641_v20 = vsel %vm1617_vm14, %v4014_v22, %v1609_v10 }
 0x367   : > { %v1586_v4 = vsub.f32 %v3079_v51, %v3081_v6  ;;  %v4177_v31 = vadd.f32 %v4024_v3, %v1698_v9  ;;  %v2052_v7 = vmul.f32 %v4151_v14, %v4151_v14  ;;  %v1649_v8 = vmul.f32 %v1641_v20, %v3825_v35 }
 0x368   : > { %v4183_v21 = vmul.f32 %v1641_v20, %v3838_v54  ;;  %v1611_v41 = vmul.f32 %v4045_v23, %v1595_v12  ;;  %v2067_v48 = vadd.f32 %v2066_v44, %v2065_v15  ;;  %v3083_v29 = vpop.eup %3082  ;;  %vm1620_vm2 = vcmp.lt.f32.partialorder %v4031_v57, 1e-06 }
 0x369   : > { %v1594_v43 = vmul.f32 0.5, %v1586_v4  ;;  %v2079_v58 = vadd.f32 %v2059_v63, %v2051_v34  ;;  %v2058_v3 = vmul.f32 %v4177_v31, %v4177_v31  ;;  %v1700_v22 = vadd.f32 %v1684_v46, %v4107_v2  ;;  %v4794_v2 = vld [vmem:[#allocation24_spill] sm:$0xff] }
 0x36a   : > { %v1643_v35 = vsel %vm1619_vm15, %v4020_v47, %v1611_v41  ;;  %v2068_v24 = vrot.slane %v2067_v48, 2  ;;  %v1569_v54 = vadd.f32 %v3073_v25, %v3071_v53  ;;  %v1571_v28 = vadd.f32 %v3077_v17, %v3075_v19  ;;  %v4795_v19 = vld [vmem:[#allocation12_spill] sm:$0xff]  ;;  %v4796_v17 = vld [vmem:[#allocation13_spill] sm:$0xff] }
 0x36b   : > { %v3085_v0 = vpop.eup %3084  ;;  %v1651_v23 = vmul.f32 %v1643_v35, %v3828_v38  ;;  %v4195_v26 = vmul.f32 %v1643_v35, %v3841_v61  ;;  %v1610_v42 = vmul.f32 %v4081_v30, %v1594_v43  ;;  %v2080_v40 = vrot.slane %v2079_v58, 4 }
 0x36c   : > { %v1588_v5 = vsub.f32 %v3083_v29, %v3085_v0  ;;  %v2069_v33 = vadd.f32 %v2068_v24, %v2067_v48  ;;  %v2072_v56 = vadd.f32 %v2058_v3, %v2050_v62  ;;  %v4199_v34 = vadd.f32 %v4794_v2, %v1700_v22  ;;  %v4798_v22 = vld [vmem:[#allocation14_spill] sm:$0xff] }
 0x36d   : > { %v1642_v55 = vsel %vm1618_vm1, %v1634_v49, %v1610_v42  ;;  %v2081_v47 = vadd.f32 %v2080_v40, %v2079_v58  ;;  %v1577_v53 = vmul.f32 0.5, %v1569_v54  ;;  %v1579_v25 = vmul.f32 0.5, %v1571_v28  ;;  %v4797_v58 = vld [vmem:[#allocation15_spill] sm:$0xff]  ;;  %v4799_v54 = vld [vmem:[#allocation25_spill] sm:$0xff] }
 0x36e   : > { %v1650_v38 = vmul.f32 %v1642_v55, %v4795_v19  ;;  %v4205_v61 = vmul.f32 %v1642_v55, %v4796_v17  ;;  %v1596_v60 = vmul.f32 0.5, %v1588_v5  ;;  %v2070_v30 = vrot.slane %v2069_v33, 1 }
 0x36f   : > { %v2082_v32 = vrot.slane %v2081_v47, 2  ;;  %v2073_v15 = vrot.slane %v2072_v56, 4  ;;  %v2060_v10 = vmul.f32 %v4199_v34, %v4199_v34  ;;  %v1677_v9 = vmul.f32 %v3952_v1, %v1577_v53 }
 0x370   : > { %v1612_v36 = vmul.f32 %v4098_v52, %v1596_v60  ;;  %v2071_v49 = vadd.f32 %v2070_v30, %v2069_v33  ;;  %v1679_v62 = vmul.f32 %v3952_v1, %v1579_v25  ;;  %v1570_v12 = vadd.f32 %v3081_v6, %v3079_v51  ;;  %v4802_v30 = vld [vmem:[#allocation21_spill] sm:$0xff] }
 0x371   : > { %v2083_v44 = vadd.f32 %v2082_v32, %v2081_v47  ;;  %v2074_v63 = vadd.f32 %v2073_v15, %v2072_v56  ;;  %v2086_v46 = vadd.f32 %v2060_v10, %v2052_v7  ;;  %v1693_v20 = vadd.f32 %v1677_v9, %v1649_v8  ;;  %v4800_v8 = vld [vmem:[#allocation26_spill] sm:$0xff] }
 0x372   : > { %v1644_v4 = vsel %vm1620_vm2, %v4142_v13, %v1612_v36  ;;  %v2137_v41 = vsub.f32 %v2071_v49, %v4145_v27  ;;  %v1695_v48 = vadd.f32 %v1679_v62, %v1651_v23  ;;  %v1578_v43 = vmul.f32 0.5, %v1570_v12  ;;  %v4804_v10 = vld [vmem:[#allocation22_spill] sm:$0xff] }
 0x373   : > { %v1652_v3 = vmul.f32 %v1644_v4, %v4797_v58  ;;  %v4218_v52 = vmul.f32 %v1644_v4, %v4798_v22  ;;  %v2084_v35 = vrot.slane %v2083_v44, 1  ;;  %v2075_v24 = vrot.slane %v2074_v63, 2  ;;  %v4805_v62 = vld [vmem:[#allocation18_spill] sm:$0xff] }
 0x374   : > { %v2145_v51 = vand.u32 2147483647, %v2137_v41  ;;  %v2087_v6 = vrot.slane %v2086_v46, 4  ;;  %v4221_v7 = vadd.f32 %v4799_v54, %v1693_v20  ;;  %v4224_v28 = vadd.f32 %v4800_v8, %v1695_v48  ;;  %v4806_v41 = vld [vmem:[#allocation23_spill] sm:$0xff] }
 0x375   : > { %v2085_v57 = vadd.f32 %v2084_v35, %v2083_v44  ;;  %v2076_v13 = vadd.f32 %v2075_v24, %v2074_v63  ;;  %v1678_v27 = vmul.f32 %v3952_v1, %v1578_v43  ;;  %v1572_v23 = vadd.f32 %v3085_v0, %v3083_v29  ;;  %v4803_v29 = vld [vmem:[#allocation17_spill] sm:$0xff]  ;;  %v4260_v24 = vld [vmem:[%s3505_s21 + $0x18] sm:$0xff] }
 0x376   : > { %v2124_v42 = vmul.f32 2.0, %v4151_v14  ;;  %v2153_v40 = vmax.f32 %v2145_v51, 1e-08  ;;  %v4801_v5 = vlaneseq  ;;  %v2088_v56 = vadd.f32 %v2087_v6, %v2086_v46  ;;  %v4807_v54 = vld [vmem:[#allocation19_spill] sm:$0xff] }
 0x377   : > { %v2139_v2 = vsub.f32 %v2085_v57, %v4158_v45  ;;  %v2077_v55 = vrot.slane %v2076_v13, 1  ;;  %v1694_v47 = vadd.f32 %v1678_v27, %v1650_v38  ;;  %v1580_v19 = vmul.f32 0.5, %v1572_v23 }
 0x378   : > { %v2179_v33 = vshrl.u32 %v4801_v5, 7  ;;  %v2130_v17 = vmul.f32 %v4165_v11, %v4134_v59  ;;  %3086 = vrsqrt.f32 %v2153_v40  ;;  %v2089_v60 = vrot.slane %v2088_v56, 2 }
 0x379   : > { %v1952_v0 = vadd.f32 %v4803_v29, %v4802_v30  ;;  %v2147_v32 = vand.u32 2147483647, %v2139_v2  ;;  %v2078_v15 = vadd.f32 %v2077_v55, %v2076_v13  ;;  %v4237_v9 = vadd.f32 %v4804_v10, %v1694_v47  ;;  %v4808_v29 = vld [vmem:[#allocation20_spill] sm:$0xff] }
 0x37a   : > { %v1680_v36 = vmul.f32 %v3952_v1, %v1580_v19  ;;  %v2090_v49 = vadd.f32 %v2089_v60, %v2088_v56  ;;  %v1685_v45 = vmul.f32 %v3961_v16, %v1577_v53  ;;  %v1687_v38 = vmul.f32 %v3961_v16, %v1579_v25  ;;  %v4284_v60 = vld [vmem:[%s3505_s21] sm:$0xff] }
 0x37b   : > { %v2029_v11 = vadd.f32 %v4805_v62, %v4802_v30  ;;  %v2132_v12 = vmul.f32 %v2124_v42, %v4151_v14  ;;  %v2155_v44 = vmax.f32 %v2147_v32, 1e-08  ;;  %v2138_v63 = vsub.f32 %v2078_v15, %v2130_v17 }
 0x37c   : > { %v1696_v46 = vadd.f32 %v1680_v36, %v1652_v3  ;;  %v2091_v20 = vrot.slane %v2090_v49, 1  ;;  %v1701_v4 = vadd.f32 %v1685_v45, %v4183_v21  ;;  %v2053_v1 = vmul.f32 %v4221_v7, %v4221_v7 }
 0x37d   : > { %v1703_v53 = vadd.f32 %v1687_v38, %v4195_v26  ;;  %3088 = vrsqrt.f32 %v2155_v44  ;;  %v2146_v25 = vand.u32 2147483647, %v2138_v63  ;;  %v2055_v58 = vmul.f32 %v4224_v28, %v4224_v28 }
 0x37e   : > { %v4250_v48 = vadd.f32 %v4806_v41, %v1696_v46  ;;  %v2092_v22 = vadd.f32 %v2091_v20, %v2090_v49  ;;  %v4254_v35 = vadd.f32 %v1952_v0, %v1701_v4  ;;  %v1686_v21 = vmul.f32 %v3961_v16, %v1578_v43 }
 0x37f   : > { %v4256_v3 = vadd.f32 %v2029_v11, %v1703_v53  ;;  %v4263_v51 = vmul.f32 2.0, %v4260_v24  ;;  %v4266_v26 = vstv %s4229_s16  ;;  %v2154_v6 = vmax.f32 %v2146_v25, 1e-08  ;;  %v4313_v25 = vld [vmem:[%s3505_s21 + $0x40] sm:$0xff] }
 0x380   : > { %v1954_v8 = vadd.f32 %v4807_v54, %v4802_v30  ;;  %v2140_v57 = vsub.f32 %v2092_v22, %v2132_v12  ;;  %v2061_v13 = vmul.f32 %v4254_v35, %v4254_v35  ;;  %v1702_v43 = vadd.f32 %v1686_v21, %v4205_v61 }
 0x381   : > { %v2063_v27 = vmul.f32 %v4256_v3, %v4256_v3  ;;  %v4275_v23 = vsub.s32 0, %v2179_v33  ;;  %3090 = vrsqrt.f32 %v2154_v6  ;;  %v2054_v42 = vmul.f32 %v4237_v9, %v4237_v9 }
 0x382   : > { %v1688_v40 = vmul.f32 %v3961_v16, %v1580_v19  ;;  %v3087_v5 = vpop.eup %3086  ;;  %v2148_v56 = vand.u32 2147483647, %v2140_v57  ;;  %v2093_v2 = vadd.f32 %v2061_v13, %v2053_v1  ;;  %v4280_v47 = vadd.f32 %v1954_v8, %v1702_v43 }
 0x383   : > { %v2107_v55 = vadd.f32 %v2063_v27, %v2055_v58  ;;  %v2170_v17 = vmul.f32 %v3087_v5, %v4266_v26  ;;  %v4287_v61 = vmul.f32 2.0, %v4284_v60  ;;  %v2031_v0 = vadd.f32 %v4808_v29, %v4802_v30 }
 0x384   : > { %v1704_v33 = vadd.f32 %v1688_v40, %v4218_v52  ;;  %v2156_v32 = vmax.f32 %v2148_v56, 1e-08  ;;  %v2094_v16 = vrot.slane %v2093_v2, 4  ;;  %v2062_v15 = vmul.f32 %v4280_v47, %v4280_v47 }
 0x385   : > { %v2108_v19 = vrot.slane %v2107_v55, 4  ;;  %v2181_v10 = vrot.slane %v2170_v17, %v4275_v23  ;;  %v2125_v36 = vmul.f32 2.0, %v4221_v7  ;;  %v2056_v45 = vmul.f32 %v4250_v48, %v4250_v48 }
 0x386   : > { %v4296_v49 = vadd.f32 %v2031_v0, %v1704_v33  ;;  %3092 = vrsqrt.f32 %v2156_v32  ;;  %v2095_v52 = vadd.f32 %v2094_v16, %v2093_v2  ;;  %v2100_v38 = vadd.f32 %v2062_v15, %v2054_v42  ;;  %v4336_v0 = vld [vmem:[%s3505_s21 + $0x50] sm:$0xff] }
 0x387   : > { %v2109_v30 = vadd.f32 %v2108_v19, %v2107_v55  ;;  %v3089_v62 = vpop.eup %3088  ;;  %v4301_v11 = vmul.f32 %v2181_v10, %v4117_v18  ;;  %v4304_v12 = vmul.f32 %v2181_v10, %v4137_v37  ;;  %v2127_v44 = vmul.f32 2.0, %v4224_v28  ;;  %v4318_v37 = vld [vmem:[%s3505_s21 + $0x10] sm:$0xff] }
 0x388   : > { %v2064_v63 = vmul.f32 %v4296_v49, %v4296_v49  ;;  %v2172_v46 = vmul.f32 %v3089_v62, %v4266_v26  ;;  %v2096_v20 = vrot.slane %v2095_v52, 2  ;;  %v2101_v1 = vrot.slane %v2100_v38, 4 }
 0x389   : > { %v2110_v4 = vrot.slane %v2109_v30, 2  ;;  %v2226_v53 = vmul.f32 %v4284_v60, %v4301_v11  ;;  %v2234_v18 = vmul.f32 %v4313_v25, %v4304_v12  ;;  %v4321_v41 = vmul.f32 2.0, %v4318_v37 }
 0x38a   : > { %v2114_v58 = vadd.f32 %v2064_v63, %v2056_v45  ;;  %v2189_v22 = vrot.slane %v2172_v46, %v4275_v23  ;;  %v2097_v21 = vadd.f32 %v2096_v20, %v2095_v52  ;;  %v2102_v54 = vadd.f32 %v2101_v1, %v2100_v38 }
 0x38b   : > { %v2111_v6 = vadd.f32 %v2110_v4, %v2109_v30  ;;  %v3091_v8 = vpop.eup %3090  ;;  %v2242_v57 = vadd.f32 %v2234_v18, %v2226_v53  ;;  %v2133_v13 = vmul.f32 %v2125_v36, %v4221_v7  ;;  %v2135_v27 = vmul.f32 %v2127_v44, %v4224_v28  ;;  %v4350_v4 = vld [vmem:[%s3505_s21 + $0x8] sm:$0xff] }
 0x38c   : > { %v2115_v43 = vrot.slane %v2114_v58, 4  ;;  %v4327_v42 = vmul.f32 %v2189_v22, %v4127_v39  ;;  %v4330_v40 = vmul.f32 %v2189_v22, %v4161_v50  ;;  %v2171_v5 = vmul.f32 %v3091_v8, %v4266_v26  ;;  %v4355_v53 = vld [vmem:[%s3505_s21 + $0x48] sm:$0xff] }
 0x38d   : > { %v2098_v56 = vrot.slane %v2097_v21, 1  ;;  %v2243_v2 = vrot.slane %v2242_v57, 4  ;;  %v2112_v55 = vrot.slane %v2111_v6, 1  ;;  %v2103_v17 = vrot.slane %v2102_v54, 2 }
 0x38e   : > { %v2116_v33 = vadd.f32 %v2115_v43, %v2114_v58  ;;  %v2228_v29 = vmul.f32 %v4318_v37, %v4327_v42  ;;  %v2236_v32 = vmul.f32 %v4336_v0, %v4330_v40  ;;  %v2185_v39 = vrot.slane %v2171_v5, %v4275_v23 }
 0x38f   : > { %v2126_v50 = vmul.f32 2.0, %v4237_v9  ;;  %v2244_v16 = vadd.f32 %v2243_v2, %v2242_v57  ;;  %v2099_v19 = vadd.f32 %v2098_v56, %v2097_v21  ;;  %v2113_v15 = vadd.f32 %v2112_v55, %v2111_v6 }
 0x390   : > { %v2104_v10 = vadd.f32 %v2103_v17, %v2102_v54  ;;  %v3093_v36 = vpop.eup %3092  ;;  %v2256_v45 = vadd.f32 %v2236_v32, %v2228_v29  ;;  %v4343_v52 = vmul.f32 %v2185_v39, %v4134_v59  ;;  %v4346_v30 = vmul.f32 %v2185_v39, %v4177_v31 }
 0x391   : > { %v2117_v38 = vrot.slane %v2116_v33, 2  ;;  %v2245_v62 = vrot.slane %v2244_v16, 2  ;;  %v2173_v44 = vmul.f32 %v3093_v36, %v4266_v26  ;;  %v2141_v63 = vsub.f32 %v2099_v19, %v2133_v13 }
 0x392   : > { %v2143_v46 = vsub.f32 %v2113_v15, %v2135_v27  ;;  %v2257_v20 = vrot.slane %v2256_v45, 4  ;;  %v2227_v1 = vmul.f32 %v4350_v4, %v4343_v52  ;;  %v2235_v59 = vmul.f32 %v4355_v53, %v4346_v30 }
 0x393   : > { %v2134_v31 = vmul.f32 %v2126_v50, %v4237_v9  ;;  %v2246_v18 = vadd.f32 %v2245_v62, %v2244_v16  ;;  %v2193_v58 = vrot.slane %v2173_v44, %v4275_v23  ;;  %v2128_v22 = vmul.f32 2.0, %v4250_v48  ;;  %v4373_v50 = vld [vmem:[%s3505_s21 + $0x58] sm:$0xff] }
 0x394   : > { %v2149_v21 = vand.u32 2147483647, %v2141_v63  ;;  %v2258_v6 = vadd.f32 %v2257_v20, %v2256_v45  ;;  %v2249_v54 = vadd.f32 %v2235_v59, %v2227_v1  ;;  %v2151_v8 = vand.u32 2147483647, %v2143_v46 }
 0x395   : > { %v2105_v57 = vrot.slane %v2104_v10, 1  ;;  %v2247_v13 = vrot.slane %v2246_v18, 1  ;;  %v4363_v27 = vmul.f32 %v2193_v58, %v4151_v14  ;;  %v4366_v43 = vmul.f32 %v2193_v58, %v4199_v34 }
 0x396   : > { %v2118_v5 = vadd.f32 %v2117_v38, %v2116_v33  ;;  %v2259_v56 = vrot.slane %v2258_v6, 2  ;;  %v2250_v2 = vrot.slane %v2249_v54, 4  ;;  %v2157_v55 = vmax.f32 %v2149_v21, 1e-08 }
 0x397   : > { %v2106_v17 = vadd.f32 %v2105_v57, %v2104_v10  ;;  %v2248_v29 = vadd.f32 %v2247_v13, %v2246_v18  ;;  %v2306_v32 = vmul.f32 %v4287_v61, %v4301_v11  ;;  %v2229_v39 = vmul.f32 %v4260_v24, %v4363_v27 }
 0x398   : > { %v2237_v14 = vmul.f32 %v4373_v50, %v4366_v43  ;;  %v2260_v16 = vadd.f32 %v2259_v56, %v2258_v6  ;;  %v2251_v34 = vadd.f32 %v2250_v2, %v2249_v54  ;;  %v4378_v33 = vmul.f32 %v2128_v22, %v4250_v48 }
 0x399   : > { %v2142_v19 = vsub.f32 %v2106_v17, %v2134_v31  ;;  %v2314_v15 = vsub.f32 %v2248_v29, %v2306_v32  ;;  %v2308_v10 = vmul.f32 %v4321_v41, %v4327_v42  ;;  %v2119_v61 = vrot.slane %v2118_v5, 1  ;;  %v4809_v31 = vld [vmem:[#allocation16_spill] sm:$0xff] }
 0x39a   : > { %v2263_v36 = vadd.f32 %v2237_v14, %v2229_v39  ;;  %v2261_v45 = vrot.slane %v2260_v16, 1  ;;  %v2252_v38 = vrot.slane %v2251_v34, 2  ;;  %3094 = vrsqrt.f32 %v2157_v55 }
 0x39b   : > { %v2159_v62 = vmax.f32 %v2151_v8, 1e-08  ;;  %v2322_v44 = vsub.f32 0.0, %v2314_v15  ;;  %v2445_v63 = vrot.slane %v2314_v15, %v4275_v23  ;;  %v4383_v20 = vadd.f32 %v2119_v61, %v2118_v5 }
 0x39c   : > { %v2264_v46 = vrot.slane %v2263_v36, 4  ;;  %v2262_v1 = vadd.f32 %v2261_v45, %v2260_v16  ;;  %v2253_v59 = vadd.f32 %v2252_v38, %v2251_v34  ;;  %v2307_v18 = vmul.f32 %v4809_v31, %v4343_v52 }
 0x39d   : > { %v2150_v58 = vand.u32 2147483647, %v2142_v19  ;;  %v4387_v22 = vmax.f32 %v2322_v44, 1.0000001  ;;  %v2474_v41 = vmul.f32 %v4284_v60, %v2445_v63  ;;  %v2482_v21 = vmul.f32 %v4313_v25, %v2445_v63 }
 0x39e   : > { %v2265_v6 = vadd.f32 %v2264_v46, %v2263_v36  ;;  %v2316_v54 = vsub.f32 %v2262_v1, %v2308_v10  ;;  %v2254_v8 = vrot.slane %v2253_v59, 1  ;;  %3096 = vrsqrt.f32 %v2159_v62 }
 0x39f   : > { %v2144_v57 = vsub.f32 %v4383_v20, %v4378_v33  ;;  %v2865_v13 = vadd.f32 -1.0, %v4387_v22  ;;  %v2346_v5 = vadd.f32 1.0, %v4387_v22  ;;  %v4396_v56 = vadd.f32 %v2474_v41, %v4301_v11 }
 0x3a0   : > { %v4399_v2 = vadd.f32 %v2482_v21, %v4304_v12  ;;  %v2324_v60 = vsub.f32 0.0, %v2316_v54  ;;  %v2453_v25 = vrot.slane %v2316_v54, %v4275_v23  ;;  %v2255_v55 = vadd.f32 %v2254_v8, %v2253_v59 }
 0x3a1   : > { %v2158_v17 = vmax.f32 %v2150_v58, 1e-08  ;;  %v4402_v29 = vmul.f32 %v2865_v13, %v2346_v5  ;;  %v2506_v32 = vmul.f32 %v4396_v56, %v4396_v56  ;;  %v2266_v14 = vrot.slane %v2265_v6, 2 }
 0x3a2   : > { %v2514_v39 = vmul.f32 %v4399_v2, %v4399_v2  ;;  %v4408_v16 = vmax.f32 %v2324_v60, 1.0000001  ;;  %v2476_v11 = vmul.f32 %v4318_v37, %v2453_v25  ;;  %v2484_v12 = vmul.f32 %v4336_v0, %v2453_v25 }
 0x3a3   : > { %v2315_v34 = vsub.f32 %v2255_v55, %v2307_v18  ;;  %3098 = vrsqrt.f32 %v4402_v29  ;;  %v2309_v19 = vmul.f32 %v4263_v51, %v4363_v27  ;;  %v2578_v45 = vmul.f32 2.0, %v4396_v56 }
 0x3a4   : > { %v3095_v15 = vpop.eup %3094  ;;  %v2522_v10 = vadd.f32 %v2514_v39, %v2506_v32  ;;  %v2867_v36 = vadd.f32 -1.0, %v4408_v16  ;;  %v2348_v61 = vadd.f32 1.0, %v4408_v16  ;;  %3100 = vrsqrt.f32 %v2158_v17 }
 0x3a5   : > { %v4419_v38 = vadd.f32 %v2476_v11, %v4327_v42  ;;  %v4422_v37 = vadd.f32 %v2484_v12, %v4330_v40  ;;  %v2323_v0 = vsub.f32 0.0, %v2315_v34  ;;  %v2449_v51 = vrot.slane %v2315_v34, %v4275_v23 }
 0x3a6   : > { %v2523_v62 = vrot.slane %v2522_v10, 4  ;;  %v4424_v44 = vmul.f32 %v2867_v36, %v2348_v61  ;;  %v2267_v63 = vadd.f32 %v2266_v14, %v2265_v6  ;;  %v2174_v42 = vmul.f32 %v3095_v15, %v4266_v26 }
 0x3a7   : > { %v2508_v46 = vmul.f32 %v4419_v38, %v4419_v38  ;;  %v2516_v1 = vmul.f32 %v4422_v37, %v4422_v37  ;;  %v4431_v59 = vmax.f32 %v2323_v0, 1.0000001  ;;  %vm2364_vm3 = vcmp.eq.f32.partialorder %v4402_v29, inf }
 0x3a8   : > { %v3097_v31 = vpop.eup %3096  ;;  %vm2366_vm4 = vcmp.eq.f32.partialorder %v4402_v29, 0.0  ;;  %v2524_v40 = vadd.f32 %v2523_v62, %v2522_v10  ;;  %3102 = vrsqrt.f32 %v4424_v44  ;;  %v2367_v18 = vand.u32 2147483648, %v4402_v29 }
 0x3a9   : > { %v2586_v58 = vmul.f32 %v2578_v45, %v4396_v56  ;;  %v2536_v41 = vadd.f32 %v2516_v1, %v2508_v46  ;;  %v2866_v21 = vadd.f32 -1.0, %v4431_v59  ;;  %v2347_v54 = vadd.f32 1.0, %v4431_v59 }
 0x3aa   : > { %v2525_v6 = vrot.slane %v2524_v40, 2  ;;  %v2475_v8 = vmul.f32 %v4350_v4, %v2449_v51  ;;  %v2483_v13 = vmul.f32 %v4355_v53, %v2449_v51  ;;  %v2580_v60 = vmul.f32 2.0, %v4419_v38 }
 0x3ab   : > { %v2537_v5 = vrot.slane %v2536_v41, 4  ;;  %v2268_v25 = vrot.slane %v2267_v63, 1  ;;  %v2197_v55 = vrot.slane %v2174_v42, %v4275_v23  ;;  %vm2378_vm5 = vcmp.eq.f32.partialorder %v4424_v44, inf }
 0x3ac   : > { %v2526_v17 = vadd.f32 %v2525_v6, %v2524_v40  ;;  %v4446_v32 = vmul.f32 %v2866_v21, %v2347_v54  ;;  %v4449_v39 = vadd.f32 %v2475_v8, %v4343_v52  ;;  %v4452_v14 = vadd.f32 %v2483_v13, %v4346_v30  ;;  %v4481_v6 = vld [vmem:[%s3505_s21 + $0x20] sm:$0xff] }
 0x3ad   : > { %v3099_v4 = vpop.eup %3098  ;;  %v2538_v11 = vadd.f32 %v2537_v5, %v2536_v41  ;;  %v2269_v53 = vadd.f32 %v2268_v25, %v2267_v63  ;;  %v4455_v12 = vmul.f32 %v2197_v55, %v4221_v7  ;;  %v4458_v34 = vmul.f32 %v2197_v55, %v4254_v35  ;;  %v4488_v5 = vld [vmem:[%s3505_s21 + $0x60] sm:$0xff] }
 0x3ae   : > { %v4460_v15 = vpop.eup %3100  ;;  %v2363_v10 = vmul.f32 %v3099_v4, %v4402_v29  ;;  %v2527_v36 = vrot.slane %v2526_v17, 1  ;;  %vm2380_vm6 = vcmp.eq.f32.partialorder %v4424_v44, 0.0  ;;  %3104 = vrsqrt.f32 %v4446_v32 }
 0x3af   : > { %v2381_v52 = vand.u32 2147483648, %v4424_v44  ;;  %v2539_v30 = vrot.slane %v2538_v11, 2  ;;  %v2588_v61 = vmul.f32 %v2580_v60, %v4419_v38  ;;  %v2507_v7 = vmul.f32 %v4449_v39, %v4449_v39 }
 0x3b0   : > { %v2365_v35 = vsel %vm2364_vm3, %v4402_v29, %v2363_v10  ;;  %v2528_v45 = vadd.f32 %v2527_v36, %v2526_v17  ;;  %v2515_v0 = vmul.f32 %v4452_v14, %v4452_v14  ;;  %v2176_v62 = vmul.f32 %v3097_v31, %v4266_v26 }
 0x3b1   : > { %v2368_v51 = vsel %vm2366_vm4, %v2367_v18, %v2365_v35  ;;  %v2540_v63 = vadd.f32 %v2539_v30, %v2538_v11  ;;  %v2579_v46 = vmul.f32 2.0, %v4449_v39  ;;  %v2317_v1 = vsub.f32 %v2269_v53, %v2309_v19 }
 0x3b2   : > { %v3103_v42 = vpop.eup %3102  ;;  %v2418_v40 = vadd.f32 %v2368_v51, %v4387_v22  ;;  %v2594_v41 = vsub.f32 %v2528_v45, %v2586_v58  ;;  %vm2371_vm7 = vcmp.eq.f32.partialorder %v4446_v32, inf  ;;  %v2529_v21 = vadd.f32 %v2515_v0, %v2507_v7 }
 0x3b3   : > { %v2230_v31 = vmul.f32 %v4481_v6, %v4455_v12  ;;  %v2377_v29 = vmul.f32 %v3103_v42, %v4424_v44  ;;  %v2541_v18 = vrot.slane %v2540_v63, 1  ;;  %v2325_v54 = vsub.f32 0.0, %v2317_v1 }
 0x3b4   : > { %v2457_v8 = vrot.slane %v2317_v1, %v4275_v23  ;;  %3106 = vlog2.f32 %v2418_v40  ;;  %v2602_v19 = vmax.f32 %v2594_v41, 1e-08  ;;  %v2530_v13 = vrot.slane %v2529_v21, 4 }
 0x3b5   : > { %v2238_v22 = vmul.f32 %v4488_v5, %v4458_v34  ;;  %v2379_v58 = vsel %vm2378_vm5, %v4424_v44, %v2377_v29  ;;  %v2542_v60 = vadd.f32 %v2541_v18, %v2540_v63  ;;  %v4495_v25 = vmax.f32 %v2325_v54, 1.0000001 }
 0x3b6   : > { %v2477_v55 = vmul.f32 %v4260_v24, %v2457_v8  ;;  %3108 = vrsqrt.f32 %v2602_v19  ;;  %v2382_v17 = vsel %vm2380_vm6, %v2381_v52, %v2379_v58  ;;  %v2531_v4 = vadd.f32 %v2530_v13, %v2529_v21 }
 0x3b7   : > { %v2485_v11 = vmul.f32 %v4373_v50, %v2457_v8  ;;  %v2420_v53 = vadd.f32 %v2382_v17, %v4408_v16  ;;  %v2596_v10 = vsub.f32 %v2542_v60, %v2588_v61  ;;  %v2868_v36 = vadd.f32 -1.0, %v4495_v25 }
 0x3b8   : > { %v2349_v30 = vadd.f32 1.0, %v4495_v25  ;;  %v3105_v7 = vpop.eup %3104  ;;  %v2532_v35 = vrot.slane %v2531_v4, 2  ;;  %v4505_v45 = vadd.f32 %v2477_v55, %v4363_v27  ;;  %v2270_v44 = vadd.f32 %v2238_v22, %v2230_v31 }
 0x3b9   : > { %v4508_v24 = vadd.f32 %v2485_v11, %v4366_v43  ;;  %3110 = vlog2.f32 %v2420_v53  ;;  %v2604_v52 = vmax.f32 %v2596_v10, 1e-08  ;;  %v2370_v50 = vmul.f32 %v3105_v7, %v4446_v32  ;;  %v4541_v53 = vld [vmem:[%s3505_s21 + $0x30] sm:$0xff] }
 0x3ba   : > { %v4511_v0 = vmul.f32 %v2868_v36, %v2349_v30  ;;  %v2374_v16 = vand.u32 2147483648, %v4446_v32  ;;  %v2533_v61 = vadd.f32 %v2532_v35, %v2531_v4  ;;  %v2509_v51 = vmul.f32 %v4505_v45, %v4505_v45 }
 0x3bb   : > { %v2517_v27 = vmul.f32 %v4508_v24, %v4508_v24  ;;  %3112 = vrsqrt.f32 %v2604_v52  ;;  %v2372_v43 = vsel %vm2371_vm7, %v4446_v32, %v2370_v50  ;;  %vm2373_vm8 = vcmp.eq.f32.partialorder %v4446_v32, 0.0 }
 0x3bc   : > { %v2375_v63 = vsel %vm2373_vm8, %v2374_v16, %v2372_v43  ;;  %v2534_v1 = vrot.slane %v2533_v61, 1  ;;  %3114 = vrsqrt.f32 %v4511_v0  ;;  %v2302_v42 = vmul.f32 2.0, %v4481_v6 }
 0x3bd   : > { %v2419_v40 = vadd.f32 %v2375_v63, %v4431_v59  ;;  %v2587_v41 = vmul.f32 %v2579_v46, %v4449_v39  ;;  %v2543_v21 = vadd.f32 %v2517_v27, %v2509_v51  ;;  %v2271_v31 = vrot.slane %v2270_v44, 4 }
 0x3be   : > { %v3107_v29 = vpop.eup %3106  ;;  %v2535_v18 = vadd.f32 %v2534_v1, %v2533_v61  ;;  %v2581_v54 = vmul.f32 2.0, %v4505_v45  ;;  %v2205_v8 = vrot.slane %v2176_v62, %v4275_v23  ;;  %v2175_v32 = vmul.f32 %v4460_v15, %v4266_v26 }
 0x3bf   : > { %v2427_v19 = vmul.f32 0.6931472, %v3107_v29  ;;  %3116 = vlog2.f32 %v2419_v40  ;;  %v2544_v13 = vrot.slane %v2543_v21, 4  ;;  %v2272_v22 = vadd.f32 %v2271_v31, %v2270_v44  ;;  %v4563_v40 = vld [vmem:[%s3505_s21 + $0x28] sm:$0xff] }
 0x3c0   : > { %v3109_v59 = vpop.eup %3108  ;;  %v2595_v58 = vsub.f32 %v2535_v18, %v2587_v41  ;;  %vm2385_vm9 = vcmp.eq.f32.partialorder %v4511_v0, inf  ;;  %v4532_v46 = vmul.f32 %v2205_v8, %v4224_v28  ;;  %v4535_v60 = vmul.f32 %v2205_v8, %v4256_v3  ;;  %v4546_v28 = vld [vmem:[%s3505_s21 + $0x70] sm:$0xff]  ;;  %v4568_v41 = vld [vmem:[%s3505_s21 + $0x68] sm:$0xff] }
 0x3c1   : > { %v2201_v62 = vrot.slane %v2175_v32, %v4275_v23  ;;  %v2618_v55 = vmul.f32 %v3109_v59, %v2427_v19  ;;  %vm2387_vm10 = vcmp.eq.f32.partialorder %v4511_v0, 0.0  ;;  %v2388_v15 = vand.u32 2147483648, %v4511_v0 }
 0x3c2   : > { %v2545_v17 = vadd.f32 %v2544_v13, %v2543_v21  ;;  %v2273_v4 = vrot.slane %v2272_v22, 2  ;;  %v2603_v11 = vmax.f32 %v2595_v58, 1e-08  ;;  %v2232_v10 = vmul.f32 %v4541_v53, %v4532_v46 }
 0x3c3   : > { %v2240_v3 = vmul.f32 %v4546_v28, %v4535_v60  ;;  %v2152_v36 = vand.u32 2147483647, %v2144_v57  ;;  %v3111_v30 = vpop.eup %3110  ;;  %v2629_v7 = vrot.slane %v2618_v55, %v4275_v23  ;;  %v4555_v52 = vmul.f32 %v2201_v62, %v4237_v9 }
 0x3c4   : > { %v2546_v35 = vrot.slane %v2545_v17, 2  ;;  %v2274_v44 = vadd.f32 %v2273_v4, %v2272_v22  ;;  %v2431_v50 = vmul.f32 0.6931472, %v3111_v30  ;;  %3118 = vrsqrt.f32 %v2603_v11 }
 0x3c5   : > { %v2284_v16 = vadd.f32 %v2240_v3, %v2232_v10  ;;  %v4558_v61 = vmul.f32 %v2201_v62, %v4280_v47  ;;  %v3113_v51 = vpop.eup %3112  ;;  %v2658_v33 = vmul.f32 %v2629_v7, %v4396_v56  ;;  %v2666_v20 = vmul.f32 %v2629_v7, %v4399_v2 }
 0x3c6   : > { %v2547_v57 = vadd.f32 %v2546_v35, %v2545_v17  ;;  %v2275_v27 = vrot.slane %v2274_v44, 1  ;;  %v3115_v43 = vpop.eup %3114  ;;  %v2620_v63 = vmul.f32 %v3113_v51, %v2431_v50  ;;  %v2231_v9 = vmul.f32 %v4563_v40, %v4555_v52 }
 0x3c7   : > { %v2285_v1 = vrot.slane %v2284_v16, 4  ;;  %v2239_v47 = vmul.f32 %v4568_v41, %v4558_v61  ;;  %2674 = vst [vmem:[%s4573_s24] sm:$0xff] %v2658_v33  ;;  %2682 = vst [vmem:[%s4573_s24 + $0x40] sm:$0xff] %v2666_v20  ;;  %v2384_v56 = vmul.f32 %v3115_v43, %v4511_v0  ;;  %v2310_v31 = vmul.f32 %v2302_v42, %v4455_v12 }
 0x3c8   : > { %v2548_v2 = vrot.slane %v2547_v57, 1  ;;  %v2276_v21 = vadd.f32 %v2275_v27, %v2274_v44  ;;  %v2637_v29 = vrot.slane %v2620_v63, %v4275_v23  ;;  %v2160_v32 = vmax.f32 %v2152_v36, 1e-08 }
 0x3c9   : > { %v2286_v18 = vadd.f32 %v2285_v1, %v2284_v16  ;;  %v2277_v8 = vadd.f32 %v2239_v47, %v2231_v9  ;;  %v3117_v19 = vpop.eup %3116  ;;  %v2386_v13 = vsel %vm2385_vm9, %v4511_v0, %v2384_v56  ;;  %v2589_v59 = vmul.f32 %v2581_v54, %v4505_v45 }
 0x3ca   : > { %v2549_v22 = vadd.f32 %v2548_v2, %v2547_v57  ;;  %v2318_v58 = vsub.f32 %v2276_v21, %v2310_v31  ;;  %v2660_v62 = vmul.f32 %v2637_v29, %v4419_v38  ;;  %v2668_v42 = vmul.f32 %v2637_v29, %v4422_v37 }
 0x3cb   : > { %v2429_v55 = vmul.f32 0.6931472, %v3117_v19  ;;  %v2389_v17 = vsel %vm2387_vm10, %v2388_v15, %v2386_v13  ;;  %v2287_v36 = vrot.slane %v2286_v18, 2  ;;  %v2278_v30 = vrot.slane %v2277_v8, 4 }
 0x3cc   : > { %v2421_v4 = vadd.f32 %v2389_v17, %v4495_v25  ;;  %v2597_v11 = vsub.f32 %v2549_v22, %v2589_v59  ;;  %v2326_v10 = vsub.f32 0.0, %v2318_v58  ;;  %v2461_v3 = vrot.slane %v2318_v58, %v4275_v23  ;;  %2676 = vst [vmem:[%s4573_s24 + $0x10] sm:$0xff] %v2660_v62  ;;  %2684 = vst [vmem:[%s4573_s24 + $0x50] sm:$0xff] %v2668_v42 }
 0x3cd   : > { %3120 = vrsqrt.f32 %v2160_v32  ;;  %v2288_v15 = vadd.f32 %v2287_v36, %v2286_v18  ;;  %v2304_v25 = vmul.f32 2.0, %v4541_v53  ;;  %v2279_v35 = vadd.f32 %v2278_v30, %v2277_v8 }
 0x3ce   : > { %3122 = vlog2.f32 %v2421_v4  ;;  %v2605_v54 = vmax.f32 %v2597_v11, 1e-08  ;;  %v4592_v38 = vmax.f32 %v2326_v10, 1.0000001  ;;  %v2478_v37 = vmul.f32 %v4481_v6, %v2461_v3  ;;  %v3119_v7 = vpop.eup %3118 }
 0x3cf   : > { %v2486_v0 = vmul.f32 %v4488_v5, %v2461_v3  ;;  %v2619_v44 = vmul.f32 %v3119_v7, %v2429_v55  ;;  %v2289_v33 = vrot.slane %v2288_v15, 1  ;;  %v2280_v57 = vrot.slane %v2279_v35, 2 }
 0x3d0   : > { %3124 = vrsqrt.f32 %v2605_v54  ;;  %v2869_v50 = vadd.f32 -1.0, %v4592_v38  ;;  %v2350_v16 = vadd.f32 1.0, %v4592_v38  ;;  %v4600_v51 = vadd.f32 %v2478_v37, %v4455_v12 }
 0x3d1   : > { %v4603_v6 = vadd.f32 %v2486_v0, %v4458_v34  ;;  %v2633_v5 = vrot.slane %v2619_v44, %v4275_v23  ;;  %v2290_v63 = vadd.f32 %v2289_v33, %v2288_v15  ;;  %v2312_v34 = vmul.f32 %v2304_v25, %v4532_v46 }
 0x3d2   : > { %v2358_v20 = vmul.f32 %v2869_v50, %v2350_v16  ;;  %v2510_v27 = vmul.f32 %v4600_v51, %v4600_v51  ;;  %v2303_v9 = vmul.f32 2.0, %v4563_v40  ;;  %v2281_v2 = vadd.f32 %v2280_v57, %v2279_v35 }
 0x3d3   : > { %v2518_v43 = vmul.f32 %v4603_v6, %v4603_v6  ;;  %v2659_v1 = vmul.f32 %v2633_v5, %v4449_v39  ;;  %v2667_v12 = vmul.f32 %v2633_v5, %v4452_v14  ;;  %v2320_v56 = vsub.f32 %v2290_v63, %v2312_v34 }
 0x3d4   : > { %3126 = vrsqrt.f32 %v2358_v20  ;;  %v2282_v32 = vrot.slane %v2281_v2, 1  ;;  %v2311_v13 = vmul.f32 %v2303_v9, %v4555_v52  ;;  %v2582_v4 = vmul.f32 2.0, %v4600_v51 }
 0x3d5   : > { %v2550_v47 = vadd.f32 %v2518_v43, %v2510_v27  ;;  %2675 = vst [vmem:[%s4573_s24 + $0x8] sm:$0xff] %v2659_v1  ;;  %2683 = vst [vmem:[%s4573_s24 + $0x48] sm:$0xff] %v2667_v12  ;;  %v2328_v18 = vsub.f32 0.0, %v2320_v56  ;;  %v2469_v8 = vrot.slane %v2320_v56, %v4275_v23  ;;  %vm2392_vm0 = vcmp.eq.f32.partialorder %v2358_v20, inf  ;;  %v4652_v1 = vld [vmem:[%s3505_s21 + $0x38] sm:$0xff] }
 0x3d6   : > { %v2283_v42 = vadd.f32 %v2282_v32, %v2281_v2  ;;  %vm2394_vm11 = vcmp.eq.f32.partialorder %v2358_v20, 0.0  ;;  %v2395_v44 = vand.u32 2147483648, %v2358_v20  ;;  %v2590_v16 = vmul.f32 %v2582_v4, %v4600_v51 }
 0x3d7   : > { %v3121_v21 = vpop.eup %3120  ;;  %v2551_v31 = vrot.slane %v2550_v47, 4  ;;  %v4619_v59 = vmax.f32 %v2328_v18, 1.0000001  ;;  %v2480_v58 = vmul.f32 %v4541_v53, %v2469_v8  ;;  %v2488_v62 = vmul.f32 %v4546_v28, %v2469_v8 }
 0x3d8   : > { %v3123_v29 = vpop.eup %3122  ;;  %v2177_v39 = vmul.f32 %v3121_v21, %v4266_v26  ;;  %v2319_v30 = vsub.f32 %v2283_v42, %v2311_v13 }
 0x3d9   : > { %v2433_v14 = vmul.f32 0.6931472, %v3123_v29  ;;  %v2552_v19 = vadd.f32 %v2551_v31, %v2550_v47  ;;  %v2871_v26 = vadd.f32 -1.0, %v4619_v59  ;;  %v2352_v10 = vadd.f32 1.0, %v4619_v59  ;;  %v4661_v47 = vld [vmem:[%s3505_s21 + $0x78] sm:$0xff]  ;;  %s2704_s21 = sshll.u32 %s4573_s24, 4  ;;  %s4713_s21 = int_to_ptr.vmem [resolvable:$true] %s2704_s21 }
 0x3da   : > { %v3125_v22 = vpop.eup %3124  ;;  %v2209_v11 = vrot.slane %v2177_v39, %v4275_v23  ;;  %v4628_v3 = vadd.f32 %v2480_v58, %v4532_v46  ;;  %v4631_v36 = vadd.f32 %v2488_v62, %v4535_v60  ;;  %v2327_v57 = vsub.f32 0.0, %v2319_v30  ;;  %s3226_s3 = scalar_lea.vmem %s4713_s21, 2048  ;;  %p3233_p5 = scmp.lt.s32.totalorder %s4713_s21, %s3231_s7 }
 0x3db   : > { %v2621_v55 = vmul.f32 %v3125_v22, %v2433_v14  ;;  %v2553_v17 = vrot.slane %v2552_v19, 2  ;;  %v2360_v7 = vmul.f32 %v2871_v26, %v2352_v10  ;;  %p3227_p12 = scmp.ne.s32.totalorder %s4713_s21, %s3226_s3  ;;  %p3234_p7 = scmp.lt.s32.totalorder %s3232_s5, %s3226_s3 }
 0x3dc   : > { %v4635_v54 = vmul.f32 %v2209_v11, %v4250_v48  ;;  %v2512_v0 = vmul.f32 %v4628_v3, %v4628_v3  ;;  %v2520_v46 = vmul.f32 %v4631_v36, %v4631_v36  ;;  %v4656_v12 = vmax.f32 %v2327_v57, 1.0000001 }
 0x3dd   : > { %v2641_v53 = vrot.slane %v2621_v55, %v4275_v23  ;;  %v2554_v28 = vadd.f32 %v2553_v17, %v2552_v19  ;;  %3128 = vrsqrt.f32 %v2360_v7  ;;  %v2584_v14 = vmul.f32 2.0, %v4628_v3  ;;  %p3228_p13 = pnand %p3227_p12, %p4810_p1  ;;  %p3235_p10 = por %p3234_p7, %p3233_p5 }
 0x3de   : > { %v3127_v37 = vpop.eup %3126  ;;  %v2564_v33 = vadd.f32 %v2520_v46, %v2512_v0  ;;  %v2870_v2 = vadd.f32 -1.0, %v4656_v12  ;;  %v2351_v21 = vadd.f32 1.0, %v4656_v12  ;;  %vm2406_vm12 = vcmp.eq.f32.partialorder %v2360_v7, inf }
 0x3df   : > { %v2661_v60 = vmul.f32 %v2641_v53, %v4505_v45  ;;  %v2669_v15 = vmul.f32 %v2641_v53, %v4508_v24  ;;  %v2391_v25 = vmul.f32 %v3127_v37, %v2358_v20  ;;  %v2555_v35 = vrot.slane %v2554_v28, 1  ;;  %p3229_p9 = pneg %p3228_p13 }
 0x3e0   : > { %v2465_v45 = vrot.slane %v2319_v30, %v4275_v23  ;;  %v4648_v24 = vmul.f32 %v2209_v11, %v4296_v49  ;;  %v2565_v63 = vrot.slane %v2564_v33, 4  ;;  %v2359_v18 = vmul.f32 %v2870_v2, %v2351_v21 }
 0x3e1   : > { %2677 = vst [vmem:[%s4573_s24 + $0x18] sm:$0xff] %v2661_v60  ;;  %2685 = vst [vmem:[%s4573_s24 + $0x58] sm:$0xff] %v2669_v15  ;;  %v2393_v48 = vsel %vm2392_vm0, %v2358_v20, %v2391_v25  ;;  %v2556_v50 = vadd.f32 %v2555_v35, %v2554_v28  ;;  %v2233_v20 = vmul.f32 %v4652_v1, %v4635_v54  ;;  %vm2408_vm13 = vcmp.eq.f32.partialorder %v2360_v7, 0.0  ;;  %p3236_p11 = pnand %p3235_p10, %p3229_p9 }
 0x3e2   : > { %v2396_v5 = vsel %vm2394_vm11, %v2395_v44, %v2393_v48  ;;  %v2479_v34 = vmul.f32 %v4563_v40, %v2465_v45  ;;  %v2487_v9 = vmul.f32 %v4568_v41, %v2465_v45  ;;  %v2241_v49 = vmul.f32 %v4661_v47, %v4648_v24 }
 0x3e3   : > { %v2422_v27 = vadd.f32 %v2396_v5, %v4592_v38  ;;  %v2598_v43 = vsub.f32 %v2556_v50, %v2590_v16  ;;  %v2566_v56 = vadd.f32 %v2565_v63, %v2564_v33  ;;  %v2409_v58 = vand.u32 2147483648, %v2360_v7 }
 0x3e4   : > { %v4668_v31 = vadd.f32 %v2479_v34, %v4555_v52  ;;  %v4671_v29 = vadd.f32 %v2487_v9, %v4558_v61  ;;  %v2291_v41 = vadd.f32 %v2241_v49, %v2233_v20  ;;  %v2592_v17 = vmul.f32 %v2584_v14, %v4628_v3 }
 0x3e5   : > { %3130 = vlog2.f32 %v2422_v27  ;;  %v2606_v38 = vmax.f32 %v2598_v43, 1e-08  ;;  %v2567_v40 = vrot.slane %v2566_v56, 2  ;;  %v2305_v37 = vmul.f32 2.0, %v4652_v1 }
 0x3e6   : > { %v2511_v8 = vmul.f32 %v4668_v31, %v4668_v31  ;;  %v2519_v32 = vmul.f32 %v4671_v29, %v4671_v29  ;;  %v2292_v19 = vrot.slane %v2291_v41, 4  ;;  %v2583_v48 = vmul.f32 2.0, %v4668_v31 }
 0x3e7   : > { %3132 = vrsqrt.f32 %v2606_v38  ;;  %v2568_v39 = vadd.f32 %v2567_v40, %v2566_v56  ;;  %v3129_v13 = vpop.eup %3128  ;;  %v2313_v33 = vmul.f32 %v2305_v37, %v4635_v54  ;;  %vm2399_vm14 = vcmp.eq.f32.partialorder %v2359_v18, inf }
 0x3e8   : > { %3134 = vrsqrt.f32 %v2359_v18  ;;  %v2405_v52 = vmul.f32 %v3129_v13, %v2360_v7  ;;  %v2557_v61 = vadd.f32 %v2519_v32, %v2511_v8  ;;  %v2293_v62 = vadd.f32 %v2292_v19, %v2291_v41 }
 0x3e9   : > { %v2569_v22 = vrot.slane %v2568_v39, 1  ;;  %v2402_v43 = vand.u32 2147483648, %v2359_v18  ;;  %vm2401_vm15 = vcmp.eq.f32.partialorder %v2359_v18, 0.0  ;;  %v2591_v9 = vmul.f32 %v2583_v48, %v4668_v31 }
 0x3ea   : > { %v2407_v42 = vsel %vm2406_vm12, %v2360_v7, %v2405_v52  ;;  %v2558_v4 = vrot.slane %v2557_v61, 4  ;;  %v2294_v26 = vrot.slane %v2293_v62, 2 }
 0x3eb   : > { %v2570_v55 = vadd.f32 %v2569_v22, %v2568_v39  ;;  %v2410_v11 = vsel %vm2408_vm13, %v2409_v58, %v2407_v42 }
 0x3ec   : > { %v2424_v53 = vadd.f32 %v2410_v11, %v4619_v59  ;;  %v2559_v30 = vadd.f32 %v2558_v4, %v2557_v61  ;;  %v2295_v46 = vadd.f32 %v2294_v26, %v2293_v62 }
 0x3ed   : > { %v2600_v28 = vsub.f32 %v2570_v55, %v2592_v17 }
 0x3ee   : > { %3136 = vlog2.f32 %v2424_v53  ;;  %v2560_v25 = vrot.slane %v2559_v30, 2  ;;  %v2296_v35 = vrot.slane %v2295_v46, 1 }
 0x3ef   : > { %v3131_v10 = vpop.eup %3130  ;;  %v2608_v15 = vmax.f32 %v2600_v28, 1e-08 }
 0x3f0   : > { %v2435_v0 = vmul.f32 0.6931472, %v3131_v10  ;;  %v2561_v44 = vadd.f32 %v2560_v25, %v2559_v30  ;;  %v2297_v16 = vadd.f32 %v2296_v35, %v2295_v46 }
 0x3f1   : > { %v3133_v60 = vpop.eup %3132  ;;  %3138 = vrsqrt.f32 %v2608_v15 }
 0x3f2   : > { %v2622_v7 = vmul.f32 %v3133_v60, %v2435_v0  ;;  %v3135_v50 = vpop.eup %3134  ;;  %v2562_v57 = vrot.slane %v2561_v44, 1  ;;  %v2321_v63 = vsub.f32 %v2297_v16, %v2313_v33 }
 0x3f3   : > { %v2398_v5 = vmul.f32 %v3135_v50, %v2359_v18 }
 0x3f4   : > { %v2645_v59 = vrot.slane %v2622_v7, %v4275_v23  ;;  %v2563_v34 = vadd.f32 %v2562_v57, %v2561_v44  ;;  %v2329_v38 = vsub.f32 0.0, %v2321_v63  ;;  %v2473_v56 = vrot.slane %v2321_v63, %v4275_v23 }
 0x3f5   : > { %v2400_v20 = vsel %vm2399_vm14, %v2359_v18, %v2398_v5 }
 0x3f6   : > { %v2662_v45 = vmul.f32 %v2645_v59, %v4600_v51  ;;  %v2670_v27 = vmul.f32 %v2645_v59, %v4603_v6  ;;  %v2403_v49 = vsel %vm2401_vm15, %v2402_v43, %v2400_v20  ;;  %v2599_v21 = vsub.f32 %v2563_v34, %v2591_v9 }
 0x3f7   : > { %v2423_v2 = vadd.f32 %v2403_v49, %v4656_v12  ;;  %v2337_v40 = vmax.f32 %v2329_v38, 1.0000001  ;;  %v2481_v51 = vmul.f32 %v4652_v1, %v2473_v56  ;;  %v2489_v6 = vmul.f32 %v4661_v47, %v2473_v56 }
 0x3f8   : > { %2678 = vst [vmem:[%s4573_s24 + $0x20] sm:$0xff] %v2662_v45  ;;  %2686 = vst [vmem:[%s4573_s24 + $0x60] sm:$0xff] %v2670_v27  ;;  %v3137_v41 = vpop.eup %3136  ;;  %v2607_v18 = vmax.f32 %v2599_v21, 1e-08 }
 0x3f9   : > { %3140 = vlog2.f32 %v2423_v2  ;;  %v2439_v8 = vmul.f32 0.6931472, %v3137_v41  ;;  %v2872_v32 = vadd.f32 -1.0, %v2337_v40  ;;  %v2353_v39 = vadd.f32 1.0, %v2337_v40 }
 0x3fa   : > { %v2497_v14 = vadd.f32 %v2481_v51, %v4635_v54  ;;  %3142 = vrsqrt.f32 %v2607_v18  ;;  %v2505_v12 = vadd.f32 %v2489_v6, %v4648_v24 }
 0x3fb   : > { %v3139_v19 = vpop.eup %3138  ;;  %v2361_v52 = vmul.f32 %v2872_v32, %v2353_v39 }
 0x3fc   : > { %v2624_v13 = vmul.f32 %v3139_v19, %v2439_v8  ;;  %v2513_v22 = vmul.f32 %v2497_v14, %v2497_v14  ;;  %v2521_v1 = vmul.f32 %v2505_v12, %v2505_v12  ;;  %v2585_v10 = vmul.f32 2.0, %v2497_v14 }
 0x3fd   : > { %3144 = vrsqrt.f32 %v2361_v52  ;;  %vm2413_vm1 = vcmp.eq.f32.partialorder %v2361_v52, inf  ;;  %v2416_v0 = vand.u32 2147483648, %v2361_v52  ;;  %vm2415_vm2 = vcmp.eq.f32.partialorder %v2361_v52, 0.0 }
 0x3fe   : > { %v2653_v47 = vrot.slane %v2624_v13, %v4275_v23  ;;  %v2571_v61 = vadd.f32 %v2521_v1, %v2513_v22  ;;  %v2593_v15 = vmul.f32 %v2585_v10, %v2497_v14 }
 0x400   : > { %v2664_v58 = vmul.f32 %v2653_v47, %v4628_v3  ;;  %v2672_v62 = vmul.f32 %v2653_v47, %v4631_v36  ;;  %v2572_v42 = vrot.slane %v2571_v61, 4 }
 0x402   : > { %2680 = vst [vmem:[%s4573_s24 + $0x30] sm:$0xff] %v2664_v58  ;;  %2688 = vst [vmem:[%s4573_s24 + $0x70] sm:$0xff] %v2672_v62  ;;  %v2573_v55 = vadd.f32 %v2572_v42, %v2571_v61 }
 0x403   : > { %v3141_v54 = vpop.eup %3140 }
 0x404   : > { %v2437_v17 = vmul.f32 0.6931472, %v3141_v54  ;;  %v3143_v4 = vpop.eup %3142  ;;  %v2574_v24 = vrot.slane %v2573_v55, 2 }
 0x406   : > { %v2623_v11 = vmul.f32 %v3143_v4, %v2437_v17  ;;  %v2575_v26 = vadd.f32 %v2574_v24, %v2573_v55 }
 0x407   : > { %v3145_v53 = vpop.eup %3144 }
 0x408   : > { %v2649_v28 = vrot.slane %v2623_v11, %v4275_v23  ;;  %v2412_v30 = vmul.f32 %v3145_v53, %v2361_v52  ;;  %v2576_v3 = vrot.slane %v2575_v26, 1 }
 0x40a   : > { %v2663_v36 = vmul.f32 %v2649_v28, %v4668_v31  ;;  %v2671_v37 = vmul.f32 %v2649_v28, %v4671_v29  ;;  %v2414_v46 = vsel %vm2413_vm1, %v2361_v52, %v2412_v30  ;;  %v2577_v60 = vadd.f32 %v2576_v3, %v2575_v26 }
 0x40b   : > { %v2417_v25 = vsel %vm2415_vm2, %v2416_v0, %v2414_v46 }
 0x40c   : > { %2679 = vst [vmem:[%s4573_s24 + $0x28] sm:$0xff] %v2663_v36  ;;  %2687 = vst [vmem:[%s4573_s24 + $0x68] sm:$0xff] %v2671_v37  ;;  %v2425_v7 = vadd.f32 %v2417_v25, %v2337_v40  ;;  %v2601_v35 = vsub.f32 %v2577_v60, %v2593_v15 }
 0x40e   : > { %3146 = vlog2.f32 %v2425_v7  ;;  %v2609_v31 = vmax.f32 %v2601_v35, 1e-08 }
 0x410   : > { %3148 = vrsqrt.f32 %v2609_v31 }
 0x418   : > { %v3147_v29 = vpop.eup %3146 }
 0x419   : > { %v2441_v44 = vmul.f32 0.6931472, %v3147_v29 }
 0x41a   : > { %v3149_v48 = vpop.eup %3148 }
 0x41b   : > { %v2625_v50 = vmul.f32 %v3149_v48, %v2441_v44 }
 0x41d   : > { %v2657_v59 = vrot.slane %v2625_v50, %v4275_v23 }
 0x41f   : > { %v2665_v16 = vmul.f32 %v2657_v59, %v2497_v14  ;;  %v2673_v33 = vmul.f32 %v2657_v59, %v2505_v12 }
 0x421   : > { %2681 = vst [vmem:[%s4573_s24 + $0x38] sm:$0xff] %v2665_v16  ;;  %2689 = vst [vmem:[%s4573_s24 + $0x78] sm:$0xff] %v2673_v33 }
 0x422   : > { %3239 = shalt.err (!%p3236_p11)
}
 0x423   : > { %s3240_s13 = scalar_lea.hbm %s4711_s9, 2048  ;;  %s3244_s14 = scalar_lea.hbm %s4762_s4, 8192 }
 0x424   : > { %p3241_p3 = scmp.ne.s32.totalorder %s4711_s9, %s3240_s13  ;;  %p3245_p2 = scmp.lt.u32.totalorder %s4711_s9, %s4762_s4 }
 0x425   : > { %p3246_p4 = scmp.lt.u32.totalorder %s3244_s14, %s3240_s13  ;;  %p3248_p12 = scmp.lt.u32.totalorder %s3240_s13, %s4711_s9 }
 0x426   : > { %p3242_p8 = pnand %p3241_p3, %p4810_p1 }
 0x427   : > { %p3247_p6 = por %p3246_p4, %p3245_p2 }
 0x428   : > { %p3243_p0 = pneg %p3242_p8 }
 0x429   : > { %p3249_p13 = por %p3248_p12, %p3247_p6 }
 0x42b   : > { %p3250_p9 = pnand %p3249_p13, %p3243_p0 }
 0x42d   : > { %3253 = shalt.err (!%p3250_p9)
}
 0x42e   : > { %s3306_s16 = smov 1024   ;;  %s3307_s24 = smov 4096  }
 0x42f   : > { %s3308_s10 = smov 64  }
 0x430   : > { %2933 = dma.vmem_to_hbm [thread:$0]  (%p4810_p1), %s4713_s21, 2048, %s4711_s9, %s2691_s23, %s3306_s16, %s3307_s24, %s3308_s10  }
 0x431 PF: > { %p2947_p5 = scmp.ge.s32.totalorder %s3296_s20, 2  ;;  %s2719_s26 = sand.u32 1, %s3284_s17  }
 0x432   : > { %p4811_p7 = scmp.ne.s32.totalorder %s4774_s29, 0  ;;  %s2720_s8 = scalar_lea.sflag [#allocation5], %s2719_s26 }
 0x434   : > { %p2943_p10 = pnand %p2947_p5, %p4811_p7 }
 0x436   : > { %3279 = dma.done.wait (!%p2943_p10), %s2720_s8, 2048  }
 0x437   : > { %3281 = vsyncadd (!%p2943_p10), %s2720_s8, 4294965248  ;;  %p21_p11 = scmp.ge.s32.totalorder %s3362_s22, 6   ;;  %s4812_s17 = smov %s3288_s18 }
 0x438   : > { %s4813_s18 = smov %s3292_s19  ;;  %s4814_s19 = smov %s3374_s25 }
 0x439   : > { %s4815_s20 = smov %s3362_s22  ;;  %23 = sbr.rel (!%p21_p11) target bundleno = 9 (0x9), region = 94 }
 0x440   :  { %2725 = vsyncpa [#allocation4], 1 }
 0x441   :  { %2727 = vsyncpa [#allocation4 + $0x1], 1 }
 0x442   :  { %2728 = vsyncpa [#allocation7], 1 }
 0x443   :  { %2730 = vsyncpa [#allocation7 + $0x1], 1 }
 0x444   :  { %2731 = vsyncpa [#allocation5], 1 }
 0x445   :  { %2733 = vsyncpa [#allocation5 + $0x1], 1 }

</bundles_post_ra>
